<compile_context>
chip_gen: v5e
topology: v5e:2x2
jax: 0.10.0
libtpu: 0.0.40
codegen_flags: <defaults>
</compile_context>

<pallas_src>
import jax
import jax.numpy as jnp
from jax import lax
from jax.experimental import pallas as pl
from jax.experimental.pallas import tpu as pltpu

NEG_SLOPE = 0.01   # nn.LeakyReLU default
EPS = 1e-5         # nn.InstanceNorm2d default


def _inv_res_block_kernel(x_ref, w1_ref, w2_ref, aff_ref, g_ref, gt_ref, out_ref):
    # x_ref:   (B, H, W*C)   B images per grid step, lane-dense last dim
    # w*_ref:  (3*W*C, W*C)  bf16 banded conv weights (row blocks: row-shift -1, 0, +1)
    # aff_ref: (4, C)        f32 [gamma1; beta1; gamma2; beta2]
    # g_ref:   (W*C, C)      f32 0/1 gather matrix: lane (j*C+ci) -> channel ci
    # gt_ref:  (C, W*C)      f32 transpose of g_ref (channel -> lanes broadcast)
    B, H, WC = x_ref.shape
    C = g_ref.shape[1]
    W = WC // C
    inv_hw = 1.0 / float(H * W)

    x_f32 = x_ref[...].astype(jnp.float32)                       # (B, H, WC)

    gamma1, beta1 = aff_ref[0:1, :], aff_ref[1:2, :]              # (1, C)
    gamma2, beta2 = aff_ref[2:3, :], aff_ref[3:4, :]

    def conv3x3(act, w_ref):
        # act: (B, H, WC) f32.  Row-shifted copies provide the kh taps / row zero-padding;
        # the kw taps and the column zero-padding are folded into the banded weight, so the
        # only data movement is 3 sublane-shifted full-lane-width copies + 128-aligned
        # lane concatenation (no masked 16-lane packing).
        zrow = jnp.zeros((B, 1, WC), jnp.float32)
        up = jnp.concatenate([zrow, act[:, :-1, :]], axis=1)      # row i -> act[i-1] (kh=0)
        dn = jnp.concatenate([act[:, 1:, :], zrow], axis=1)       # row i -> act[i+1] (kh=2)
        lhs = jnp.concatenate([up, act, dn], axis=-1)             # (B, H, 3*WC)
        lhs = lhs.reshape(B * H, 3 * WC).astype(jnp.bfloat16)     # single bf16 cast
        y = jnp.dot(lhs, w_ref[...], preferred_element_type=jnp.float32)
        return y.reshape(B, H, WC)                                # f32

    def inorm_lrelu(y, gamma, beta):
        # Per-(image, channel) InstanceNorm (biased variance) + fused affine + LeakyReLU.
        s1 = jnp.sum(y, axis=1)                                   # (B, WC) full-lane reduce
        s2 = jnp.sum(y * y, axis=1)                               # (B, WC)
        mean = jnp.dot(s1, g_ref[...], preferred_element_type=jnp.float32) * inv_hw  # (B, C)
        ex2 = jnp.dot(s2, g_ref[...], preferred_element_type=jnp.float32) * inv_hw   # (B, C)
        var = ex2 - mean * mean
        scale_c = gamma * lax.rsqrt(var + EPS)                    # (B, C)
        shift_c = beta - mean * scale_c                           # (B, C)
        scale_l = jnp.dot(scale_c, gt_ref[...], preferred_element_type=jnp.float32)  # (B, WC)
        shift_l = jnp.dot(shift_c, gt_ref[...], preferred_element_type=jnp.float32)  # (B, WC)
        yn = y * scale_l[:, None, :] + shift_l[:, None, :]
        return jnp.where(yn > 0, yn, NEG_SLOPE * yn)

    h = inorm_lrelu(conv3x3(x_f32, w1_ref), gamma1, beta1)
    h2 = inorm_lrelu(conv3x3(h, w2_ref), gamma2, beta2)

    # residual add in the lane-dense layout, unmasked store
    out_ref[...] = (h2 + x_f32).astype(out_ref.dtype)


def _eff_conv_weight(w_ct):
    # ConvTranspose2d weight (C_in, C_out, kh, kw) with stride=1, padding=1 is equivalent
    # to a 3x3 "SAME" conv with the spatially-flipped weight:
    #   w_eff[kh, kw, ci, co] = w_ct[ci, co, 2-kh, 2-kw]
    return jnp.transpose(jnp.flip(w_ct, axis=(2, 3)), (2, 3, 0, 1))


def _banded_weight(w_ct, width):
    # Build the (3*W*C, W*C) banded weight used by the kernel:
    #   Wband[kh*W*C + j'*C + ci, j*C + co] = w_eff[kh, j'-j+1, ci, co]  for |j'-j| <= 1
    # (zero otherwise).  The missing off-band blocks implement the column zero-padding.
    w_eff = _eff_conv_weight(w_ct).astype(jnp.float32)            # (3, 3, C, C)
    c = w_eff.shape[-1]
    blocks = []
    for kh in range(3):
        w3 = jnp.zeros((width * c, width * c), jnp.float32)
        for kw in range(3):
            sel = jnp.eye(width, k=1 - kw, dtype=jnp.float32)     # ones at (j', j'+1-kw)
            w3 = w3 + jnp.kron(sel, w_eff[kh, kw])
        blocks.append(w3)
    return jnp.concatenate(blocks, axis=0).astype(jnp.bfloat16)   # (3*W*C, W*C)


def _tensorcores_per_chip():
    # v7x has 2 TensorCores per chip; v5e/v6e have 1.  Only used to pick batch blocking.
    try:
        kind = jax.devices()[0].device_kind.lower()
    except Exception:
        return 1
    return 2 if ("v7" in kind or "7x" in kind) else 1


def _pick_batch_block(n):
    tc = _tensorcores_per_chip()
    if tc > 1 and n % tc == 0:
        return n // tc     # keep a parallel batch axis so every core gets work (v7x)
    return n               # single TensorCore: fold the whole batch into one grid step


def inv_res_block(x_nhwc, params):
    N, H, W, C = x_nhwc.shape
    w1, b1, g1, be1, w2, b2, g2, be2 = params
    WC = W * C
    # conv biases b1/b2 are intentionally NOT used: a per-channel bias is cancelled exactly
    # by the InstanceNorm mean subtraction (verified against the bias-including reference).
    w1b = _banded_weight(w1, W)                                    # (3*WC, WC) bf16
    w2b = _banded_weight(w2, W)
    aff = jnp.stack([g1, be1, g2, be2]).astype(jnp.float32)        # (4, C)
    gmat = jnp.tile(jnp.eye(C, dtype=jnp.float32), (W, 1))         # (WC, C): lane -> channel
    gmat_t = jnp.transpose(gmat)                                   # (C, WC)

    x3d = x_nhwc.reshape(N, H, WC)      # lane-dense: last dim = 256 (multiple of 128)

    b_blk = _pick_batch_block(N)
    grid = (N // b_blk,)

    spec_img = pl.BlockSpec((b_blk, H, WC), lambda n: (n, 0, 0))
    spec_w = pl.BlockSpec((3 * WC, WC), lambda n: (0, 0))
    spec_aff = pl.BlockSpec((4, C), lambda n: (0, 0))
    spec_g = pl.BlockSpec((WC, C), lambda n: (0, 0))
    spec_gt = pl.BlockSpec((C, WC), lambda n: (0, 0))

    out3d = pl.pallas_call(
        _inv_res_block_kernel,
        out_shape=jax.ShapeDtypeStruct((N, H, WC), x_nhwc.dtype),
        grid_spec=pltpu.PrefetchScalarGridSpec(
            num_scalar_prefetch=0,
            grid=grid,
            in_specs=[spec_img, spec_w, spec_w, spec_aff, spec_g, spec_gt],
            out_specs=spec_img,
        ),
        compiler_params=pltpu.CompilerParams(
            dimension_semantics=("parallel",)),   # disjoint image blocks -> megacore-safe
    )(x3d, w1b, w2b, aff, gmat, gmat_t)
    return out3d.reshape(N, H, W, C)


def reference(x_nhwc, params):
    # Pure-JAX reference of the same math (ConvTranspose2d == flipped conv here).
    # Conv inputs/weights are cast to bf16 with f32 accumulation to match the kernel's
    # MXU precision; biases ARE applied here (they must cancel through InstanceNorm).
    w1, b1, g1, be1, w2, b2, g2, be2 = params

    def conv(x, w_ct, b):
        w_eff = _eff_conv_weight(w_ct).astype(jnp.bfloat16)        # HWIO
        y = lax.conv_general_dilated(
            x.astype(jnp.bfloat16), w_eff, window_strides=(1, 1), padding="SAME",
            dimension_numbers=("NHWC", "HWIO", "NHWC"),
            preferred_element_type=jnp.float32)
        return y + b[None, None, None, :]

    def inorm(y, g, be):
        mean = jnp.mean(y, axis=(1, 2), keepdims=True)
        var = jnp.mean((y - mean) ** 2, axis=(1, 2), keepdims=True)
        return (y - mean) * lax.rsqrt(var + EPS) * g + be

    def lrelu(y):
        return jnp.where(y > 0, y, NEG_SLOPE * y)

    h = lrelu(inorm(conv(x_nhwc, w1, b1), g1, be1))
    h = lrelu(inorm(conv(h, w2, b2), g2, be2))
    return h + x_nhwc


if __name__ == "__main__":
    C_IN, N, H, W = 16, 2, 16, 16

    key = jax.random.PRNGKey(0)
    ks = jax.random.split(key, 9)

    x = jax.random.normal(ks[0], (N, H, W, C_IN), dtype=jnp.float32)

    # kaiming_uniform-like init for the ConvTranspose2d weights (C_in, C_out, 3, 3)
    bound = (6.0 / (C_IN * 9)) ** 0.5
    w1 = jax.random.uniform(ks[1], (C_IN, C_IN, 3, 3), jnp.float32, -bound, bound)
    w2 = jax.random.uniform(ks[2], (C_IN, C_IN, 3, 3), jnp.float32, -bound, bound)
    # non-zero conv biases on purpose: verifies that dropping them in the kernel is exact
    # (InstanceNorm cancels any per-channel pre-norm bias)
    b1 = 0.3 * jax.random.normal(ks[3], (C_IN,), jnp.float32)
    b2 = 0.3 * jax.random.normal(ks[4], (C_IN,), jnp.float32)
    # InstanceNorm affine params
    g1 = 1.0 + 0.1 * jax.random.normal(ks[5], (C_IN,), jnp.float32)
    g2 = 1.0 + 0.1 * jax.random.normal(ks[6], (C_IN,), jnp.float32)
    be1 = 0.1 * jax.random.normal(ks[7], (C_IN,), jnp.float32)
    be2 = 0.1 * jax.random.normal(ks[8], (C_IN,), jnp.float32)

    params = (w1, b1, g1, be1, w2, b2, g2, be2)

    out = jax.block_until_ready(inv_res_block(x, params))
    ref = jax.block_until_ready(reference(x, params))

    assert out.shape == (N, H, W, C_IN)
    max_err = float(jnp.max(jnp.abs(out - ref)))
    # bf16-in / f32-acc matmuls on both sides; residual mismatch is only accumulation order
    assert jnp.allclose(out, ref, atol=1e-2, rtol=1e-2), max_err

    print("KERNEL_OK")
</pallas_src>

<mosaic_0001>
module attributes {stable_mosaic.version = 11 : i64} {
  func.func @_inv_res_block_kernel(%arg0: i32, %arg1: memref<2x16x256xf32, #tpu.memory_space<vmem>>, %arg2: memref<768x256xbf16, #tpu.memory_space<vmem>>, %arg3: memref<768x256xbf16, #tpu.memory_space<vmem>>, %arg4: memref<4x16xf32, #tpu.memory_space<vmem>>, %arg5: memref<256x16xf32, #tpu.memory_space<vmem>>, %arg6: memref<16x256xf32, #tpu.memory_space<vmem>>, %arg7: memref<2x16x256xf32, #tpu.memory_space<vmem>>) attributes {dimension_semantics = [#tpu.dimension_semantics<parallel>], iteration_bounds = array<i64: 1>, scalar_prefetch = 0 : i64, scratch_operands = 0 : i64, tpu.core_type = #tpu.core_type<tc>, window_params = [{transform_indices = @transform_0, window_bounds = array<i64: 2, 16, 256>}, {pipeline_mode = #tpu.pipeline_mode<synchronous>, transform_indices = @transform_1, window_bounds = array<i64: 768, 256>}, {pipeline_mode = #tpu.pipeline_mode<synchronous>, transform_indices = @transform_2, window_bounds = array<i64: 768, 256>}, {pipeline_mode = #tpu.pipeline_mode<synchronous>, transform_indices = @transform_3, window_bounds = array<i64: 4, 16>}, {pipeline_mode = #tpu.pipeline_mode<synchronous>, transform_indices = @transform_4, window_bounds = array<i64: 256, 16>}, {pipeline_mode = #tpu.pipeline_mode<synchronous>, transform_indices = @transform_5, window_bounds = array<i64: 16, 256>}, {transform_indices = @transform_6, window_bounds = array<i64: 2, 16, 256>}]} {
    %c0 = arith.constant 0 : index
    %c0_0 = arith.constant 0 : index
    %c0_1 = arith.constant 0 : index
    %0 = vector.load %arg1[%c0, %c0_0, %c0_1] : memref<2x16x256xf32, #tpu.memory_space<vmem>>, vector<2x16x256xf32>
    %c0_2 = arith.constant 0 : index
    %c0_3 = arith.constant 0 : index
    %1 = vector.load %arg4[%c0_2, %c0_3] : memref<4x16xf32, #tpu.memory_space<vmem>>, vector<1x16xf32>
    %c1 = arith.constant 1 : index
    %c0_4 = arith.constant 0 : index
    %2 = vector.load %arg4[%c1, %c0_4] : memref<4x16xf32, #tpu.memory_space<vmem>>, vector<1x16xf32>
    %c2 = arith.constant 2 : index
    %c0_5 = arith.constant 0 : index
    %3 = vector.load %arg4[%c2, %c0_5] : memref<4x16xf32, #tpu.memory_space<vmem>>, vector<1x16xf32>
    %c3 = arith.constant 3 : index
    %c0_6 = arith.constant 0 : index
    %4 = vector.load %arg4[%c3, %c0_6] : memref<4x16xf32, #tpu.memory_space<vmem>>, vector<1x16xf32>
    %cst = arith.constant 0.000000e+00 : f32
    %5 = vector.broadcast %cst : f32 to vector<2x1x256xf32>
    %6 = vector.extract_strided_slice %0 {offsets = [0, 0, 0], sizes = [2, 15, 256], strides = [1, 1, 1]} : vector<2x16x256xf32> to vector<2x15x256xf32>
    %7 = tpu.concatenate %5, %6 in 1 : vector<2x1x256xf32>, vector<2x15x256xf32> -> vector<2x16x256xf32>
    %8 = vector.extract_strided_slice %0 {offsets = [0, 1, 0], sizes = [2, 15, 256], strides = [1, 1, 1]} : vector<2x16x256xf32> to vector<2x15x256xf32>
    %9 = tpu.concatenate %8, %5 in 1 : vector<2x15x256xf32>, vector<2x1x256xf32> -> vector<2x16x256xf32>
    %10 = tpu.concatenate %7, %0, %9 in 2 : vector<2x16x256xf32>, vector<2x16x256xf32>, vector<2x16x256xf32> -> vector<2x16x768xf32>
    %11 = vector.shape_cast %10 : vector<2x16x768xf32> to vector<32x768xf32>
    %12 = arith.truncf %11 : vector<32x768xf32> to vector<32x768xbf16>
    %c0_7 = arith.constant 0 : index
    %c0_8 = arith.constant 0 : index
    %13 = vector.load %arg2[%c0_7, %c0_8] : memref<768x256xbf16, #tpu.memory_space<vmem>>, vector<768x256xbf16>
    %cst_9 = arith.constant dense<0.000000e+00> : vector<32x256xf32>
    %14 = tpu.matmul %12, %13, %cst_9 {dimension_numbers = #tpu.dot_dimension_numbers<[1], [0], [0], [1], [0, 0, 1, 1], [], []>} : vector<32x768xbf16>, vector<768x256xbf16>, vector<32x256xf32> -> vector<32x256xf32>
    %15 = vector.shape_cast %14 : vector<32x256xf32> to vector<2x16x256xf32>
    %cst_10 = arith.constant dense<0.000000e+00> : vector<2x256xf32>
    %16 = vector.multi_reduction <add>, %15, %cst_10 [1] : vector<2x16x256xf32> to vector<2x256xf32>
    %17 = arith.mulf %15, %15 : vector<2x16x256xf32>
    %cst_11 = arith.constant dense<0.000000e+00> : vector<2x256xf32>
    %18 = vector.multi_reduction <add>, %17, %cst_11 [1] : vector<2x16x256xf32> to vector<2x256xf32>
    %c0_12 = arith.constant 0 : index
    %c0_13 = arith.constant 0 : index
    %19 = vector.load %arg5[%c0_12, %c0_13] : memref<256x16xf32, #tpu.memory_space<vmem>>, vector<256x16xf32>
    %cst_14 = arith.constant dense<0.000000e+00> : vector<2x16xf32>
    %20 = tpu.matmul %16, %19, %cst_14 {dimension_numbers = #tpu.dot_dimension_numbers<[1], [0], [0], [1], [0, 0, 1, 1], [], []>} : vector<2x256xf32>, vector<256x16xf32>, vector<2x16xf32> -> vector<2x16xf32>
    %cst_15 = arith.constant 3.906250e-03 : f32
    %21 = vector.broadcast %cst_15 : f32 to vector<2x16xf32>
    %22 = arith.mulf %20, %21 : vector<2x16xf32>
    %c0_16 = arith.constant 0 : index
    %c0_17 = arith.constant 0 : index
    %23 = vector.load %arg5[%c0_16, %c0_17] : memref<256x16xf32, #tpu.memory_space<vmem>>, vector<256x16xf32>
    %cst_18 = arith.constant dense<0.000000e+00> : vector<2x16xf32>
    %24 = tpu.matmul %18, %23, %cst_18 {dimension_numbers = #tpu.dot_dimension_numbers<[1], [0], [0], [1], [0, 0, 1, 1], [], []>} : vector<2x256xf32>, vector<256x16xf32>, vector<2x16xf32> -> vector<2x16xf32>
    %cst_19 = arith.constant 3.906250e-03 : f32
    %25 = vector.broadcast %cst_19 : f32 to vector<2x16xf32>
    %26 = arith.mulf %24, %25 : vector<2x16xf32>
    %27 = arith.mulf %22, %22 : vector<2x16xf32>
    %28 = arith.subf %26, %27 : vector<2x16xf32>
    %cst_20 = arith.constant 9.99999974E-6 : f32
    %29 = vector.broadcast %cst_20 : f32 to vector<2x16xf32>
    %30 = arith.addf %28, %29 : vector<2x16xf32>
    %31 = math.rsqrt %30 : vector<2x16xf32>
    %32 = vector.broadcast %1 : vector<1x16xf32> to vector<2x16xf32>
    %33 = arith.mulf %32, %31 : vector<2x16xf32>
    %34 = arith.mulf %22, %33 : vector<2x16xf32>
    %35 = vector.broadcast %2 : vector<1x16xf32> to vector<2x16xf32>
    %36 = arith.subf %35, %34 : vector<2x16xf32>
    %c0_21 = arith.constant 0 : index
    %c0_22 = arith.constant 0 : index
    %37 = vector.load %arg6[%c0_21, %c0_22] : memref<16x256xf32, #tpu.memory_space<vmem>>, vector<16x256xf32>
    %cst_23 = arith.constant dense<0.000000e+00> : vector<2x256xf32>
    %38 = tpu.matmul %33, %37, %cst_23 {dimension_numbers = #tpu.dot_dimension_numbers<[1], [0], [0], [1], [0, 0, 1, 1], [], []>} : vector<2x16xf32>, vector<16x256xf32>, vector<2x256xf32> -> vector<2x256xf32>
    %c0_24 = arith.constant 0 : index
    %c0_25 = arith.constant 0 : index
    %39 = vector.load %arg6[%c0_24, %c0_25] : memref<16x256xf32, #tpu.memory_space<vmem>>, vector<16x256xf32>
    %cst_26 = arith.constant dense<0.000000e+00> : vector<2x256xf32>
    %40 = tpu.matmul %36, %39, %cst_26 {dimension_numbers = #tpu.dot_dimension_numbers<[1], [0], [0], [1], [0, 0, 1, 1], [], []>} : vector<2x16xf32>, vector<16x256xf32>, vector<2x256xf32> -> vector<2x256xf32>
    %41 = vector.shape_cast %38 : vector<2x256xf32> to vector<2x1x256xf32>
    %42 = vector.broadcast %41 : vector<2x1x256xf32> to vector<2x16x256xf32>
    %43 = arith.mulf %15, %42 : vector<2x16x256xf32>
    %44 = vector.shape_cast %40 : vector<2x256xf32> to vector<2x1x256xf32>
    %45 = vector.broadcast %44 : vector<2x1x256xf32> to vector<2x16x256xf32>
    %46 = arith.addf %43, %45 : vector<2x16x256xf32>
    %cst_27 = arith.constant 0.000000e+00 : f32
    %47 = vector.broadcast %cst_27 : f32 to vector<2x16x256xf32>
    %48 = arith.cmpf ogt, %46, %47 : vector<2x16x256xf32>
    %cst_28 = arith.constant 0.00999999977 : f32
    %49 = vector.broadcast %cst_28 : f32 to vector<2x16x256xf32>
    %50 = arith.mulf %49, %46 : vector<2x16x256xf32>
    %51 = arith.select %48, %46, %50 : vector<2x16x256xi1>, vector<2x16x256xf32>
    %cst_29 = arith.constant 0.000000e+00 : f32
    %52 = vector.broadcast %cst_29 : f32 to vector<2x1x256xf32>
    %53 = vector.extract_strided_slice %51 {offsets = [0, 0, 0], sizes = [2, 15, 256], strides = [1, 1, 1]} : vector<2x16x256xf32> to vector<2x15x256xf32>
    %54 = tpu.concatenate %52, %53 in 1 : vector<2x1x256xf32>, vector<2x15x256xf32> -> vector<2x16x256xf32>
    %55 = vector.extract_strided_slice %51 {offsets = [0, 1, 0], sizes = [2, 15, 256], strides = [1, 1, 1]} : vector<2x16x256xf32> to vector<2x15x256xf32>
    %56 = tpu.concatenate %55, %52 in 1 : vector<2x15x256xf32>, vector<2x1x256xf32> -> vector<2x16x256xf32>
    %57 = tpu.concatenate %54, %51, %56 in 2 : vector<2x16x256xf32>, vector<2x16x256xf32>, vector<2x16x256xf32> -> vector<2x16x768xf32>
    %58 = vector.shape_cast %57 : vector<2x16x768xf32> to vector<32x768xf32>
    %59 = arith.truncf %58 : vector<32x768xf32> to vector<32x768xbf16>
    %c0_30 = arith.constant 0 : index
    %c0_31 = arith.constant 0 : index
    %60 = vector.load %arg3[%c0_30, %c0_31] : memref<768x256xbf16, #tpu.memory_space<vmem>>, vector<768x256xbf16>
    %cst_32 = arith.constant dense<0.000000e+00> : vector<32x256xf32>
    %61 = tpu.matmul %59, %60, %cst_32 {dimension_numbers = #tpu.dot_dimension_numbers<[1], [0], [0], [1], [0, 0, 1, 1], [], []>} : vector<32x768xbf16>, vector<768x256xbf16>, vector<32x256xf32> -> vector<32x256xf32>
    %62 = vector.shape_cast %61 : vector<32x256xf32> to vector<2x16x256xf32>
    %cst_33 = arith.constant dense<0.000000e+00> : vector<2x256xf32>
    %63 = vector.multi_reduction <add>, %62, %cst_33 [1] : vector<2x16x256xf32> to vector<2x256xf32>
    %64 = arith.mulf %62, %62 : vector<2x16x256xf32>
    %cst_34 = arith.constant dense<0.000000e+00> : vector<2x256xf32>
    %65 = vector.multi_reduction <add>, %64, %cst_34 [1] : vector<2x16x256xf32> to vector<2x256xf32>
    %c0_35 = arith.constant 0 : index
    %c0_36 = arith.constant 0 : index
    %66 = vector.load %arg5[%c0_35, %c0_36] : memref<256x16xf32, #tpu.memory_space<vmem>>, vector<256x16xf32>
    %cst_37 = arith.constant dense<0.000000e+00> : vector<2x16xf32>
    %67 = tpu.matmul %63, %66, %cst_37 {dimension_numbers = #tpu.dot_dimension_numbers<[1], [0], [0], [1], [0, 0, 1, 1], [], []>} : vector<2x256xf32>, vector<256x16xf32>, vector<2x16xf32> -> vector<2x16xf32>
    %cst_38 = arith.constant 3.906250e-03 : f32
    %68 = vector.broadcast %cst_38 : f32 to vector<2x16xf32>
    %69 = arith.mulf %67, %68 : vector<2x16xf32>
    %c0_39 = arith.constant 0 : index
    %c0_40 = arith.constant 0 : index
    %70 = vector.load %arg5[%c0_39, %c0_40] : memref<256x16xf32, #tpu.memory_space<vmem>>, vector<256x16xf32>
    %cst_41 = arith.constant dense<0.000000e+00> : vector<2x16xf32>
    %71 = tpu.matmul %65, %70, %cst_41 {dimension_numbers = #tpu.dot_dimension_numbers<[1], [0], [0], [1], [0, 0, 1, 1], [], []>} : vector<2x256xf32>, vector<256x16xf32>, vector<2x16xf32> -> vector<2x16xf32>
    %cst_42 = arith.constant 3.906250e-03 : f32
    %72 = vector.broadcast %cst_42 : f32 to vector<2x16xf32>
    %73 = arith.mulf %71, %72 : vector<2x16xf32>
    %74 = arith.mulf %69, %69 : vector<2x16xf32>
    %75 = arith.subf %73, %74 : vector<2x16xf32>
    %cst_43 = arith.constant 9.99999974E-6 : f32
    %76 = vector.broadcast %cst_43 : f32 to vector<2x16xf32>
    %77 = arith.addf %75, %76 : vector<2x16xf32>
    %78 = math.rsqrt %77 : vector<2x16xf32>
    %79 = vector.broadcast %3 : vector<1x16xf32> to vector<2x16xf32>
    %80 = arith.mulf %79, %78 : vector<2x16xf32>
    %81 = arith.mulf %69, %80 : vector<2x16xf32>
    %82 = vector.broadcast %4 : vector<1x16xf32> to vector<2x16xf32>
    %83 = arith.subf %82, %81 : vector<2x16xf32>
    %c0_44 = arith.constant 0 : index
    %c0_45 = arith.constant 0 : index
    %84 = vector.load %arg6[%c0_44, %c0_45] : memref<16x256xf32, #tpu.memory_space<vmem>>, vector<16x256xf32>
    %cst_46 = arith.constant dense<0.000000e+00> : vector<2x256xf32>
    %85 = tpu.matmul %80, %84, %cst_46 {dimension_numbers = #tpu.dot_dimension_numbers<[1], [0], [0], [1], [0, 0, 1, 1], [], []>} : vector<2x16xf32>, vector<16x256xf32>, vector<2x256xf32> -> vector<2x256xf32>
    %c0_47 = arith.constant 0 : index
    %c0_48 = arith.constant 0 : index
    %86 = vector.load %arg6[%c0_47, %c0_48] : memref<16x256xf32, #tpu.memory_space<vmem>>, vector<16x256xf32>
    %cst_49 = arith.constant dense<0.000000e+00> : vector<2x256xf32>
    %87 = tpu.matmul %83, %86, %cst_49 {dimension_numbers = #tpu.dot_dimension_numbers<[1], [0], [0], [1], [0, 0, 1, 1], [], []>} : vector<2x16xf32>, vector<16x256xf32>, vector<2x256xf32> -> vector<2x256xf32>
    %88 = vector.shape_cast %85 : vector<2x256xf32> to vector<2x1x256xf32>
    %89 = vector.broadcast %88 : vector<2x1x256xf32> to vector<2x16x256xf32>
    %90 = arith.mulf %62, %89 : vector<2x16x256xf32>
    %91 = vector.shape_cast %87 : vector<2x256xf32> to vector<2x1x256xf32>
    %92 = vector.broadcast %91 : vector<2x1x256xf32> to vector<2x16x256xf32>
    %93 = arith.addf %90, %92 : vector<2x16x256xf32>
    %cst_50 = arith.constant 0.000000e+00 : f32
    %94 = vector.broadcast %cst_50 : f32 to vector<2x16x256xf32>
    %95 = arith.cmpf ogt, %93, %94 : vector<2x16x256xf32>
    %cst_51 = arith.constant 0.00999999977 : f32
    %96 = vector.broadcast %cst_51 : f32 to vector<2x16x256xf32>
    %97 = arith.mulf %96, %93 : vector<2x16x256xf32>
    %98 = arith.select %95, %93, %97 : vector<2x16x256xi1>, vector<2x16x256xf32>
    %99 = arith.addf %98, %0 : vector<2x16x256xf32>
    %c0_52 = arith.constant 0 : index
    %c0_53 = arith.constant 0 : index
    %c0_54 = arith.constant 0 : index
    %100 = vector.load %arg7[%c0_52, %c0_53, %c0_54] : memref<2x16x256xf32, #tpu.memory_space<vmem>>, vector<2x16x256xf32>
    tpu.vector_store %arg7[%c0_52, %c0_53, %c0_54], %99 {strides = array<i32>} : memref<2x16x256xf32, #tpu.memory_space<vmem>>, vector<2x16x256xf32>,
    return
  }
  func.func @transform_0(%arg0: i32) -> (i32, i32, i32) {
    %c0_i32 = arith.constant 0 : i32
    %c0_i32_0 = arith.constant 0 : i32
    %c0_i32_1 = arith.constant 0 : i32
    return %arg0, %c0_i32, %c0_i32_0 : i32, i32, i32
  }
  func.func @transform_1(%arg0: i32) -> (i32, i32) {
    %c0_i32 = arith.constant 0 : i32
    %c0_i32_0 = arith.constant 0 : i32
    %c0_i32_1 = arith.constant 0 : i32
    return %c0_i32, %c0_i32_0 : i32, i32
  }
  func.func @transform_2(%arg0: i32) -> (i32, i32) {
    %c0_i32 = arith.constant 0 : i32
    %c0_i32_0 = arith.constant 0 : i32
    %c0_i32_1 = arith.constant 0 : i32
    return %c0_i32, %c0_i32_0 : i32, i32
  }
  func.func @transform_3(%arg0: i32) -> (i32, i32) {
    %c0_i32 = arith.constant 0 : i32
    %c0_i32_0 = arith.constant 0 : i32
    %c0_i32_1 = arith.constant 0 : i32
    return %c0_i32, %c0_i32_0 : i32, i32
  }
  func.func @transform_4(%arg0: i32) -> (i32, i32) {
    %c0_i32 = arith.constant 0 : i32
    %c0_i32_0 = arith.constant 0 : i32
    %c0_i32_1 = arith.constant 0 : i32
    return %c0_i32, %c0_i32_0 : i32, i32
  }
  func.func @transform_5(%arg0: i32) -> (i32, i32) {
    %c0_i32 = arith.constant 0 : i32
    %c0_i32_0 = arith.constant 0 : i32
    %c0_i32_1 = arith.constant 0 : i32
    return %c0_i32, %c0_i32_0 : i32, i32
  }
  func.func @transform_6(%arg0: i32) -> (i32, i32, i32) {
    %c0_i32 = arith.constant 0 : i32
    %c0_i32_0 = arith.constant 0 : i32
    %c0_i32_1 = arith.constant 0 : i32
    return %arg0, %c0_i32, %c0_i32_0 : i32, i32, i32
  }
}

</mosaic_0001>

<bundles_post_ra>
// kernel: tpu_custom_call.1
= control target key start
LH: loop header
LB: loop body
LE: loop exit
PB: predicated region body
PF: predicated region fallthrough
CT: control target
= control target key end

     0   :  { %11 = vsyncpa [#allocation3], 0  ;;  %s4532_s0 = inlined_call_operand.vmem [shape: f32[2,16,256], index: 0, kind: input, shape index: {}]   ;;  %s4533_s1 = inlined_call_operand.hbm [shape: bf16[768,256], index: 1, kind: input, shape index: {}]   ;;  %s4534_s2 = inlined_call_operand.hbm [shape: bf16[768,256], index: 2, kind: input, shape index: {}]   ;;  %s4535_s3 = inlined_call_operand.vmem [shape: f32[4,16], index: 3, kind: input, shape index: {}]   ;;  %s4536_s4 = inlined_call_operand.vmem [shape: f32[256,16], index: 4, kind: input, shape index: {}]   ;;  %s4537_s5 = inlined_call_operand.vmem [shape: f32[16,256], index: 5, kind: input, shape index: {}]   ;;  %s4538_s6 = inlined_call_operand.hbm [shape: f32[2,16,256], index: 6, kind: output, shape index: {}]  }
   0x1   :  { %12 = vsyncpa [#allocation6], 0 }
   0x2   :  { %13 = vsyncpa [#allocation4], 0  ;;  %s20_s23 = sshll.u32 %s4533_s1, 4  ;;  %s3774_s24 = smov [#allocation2]   ;;  %s21_s23 = int_to_ptr.hbm [resolvable:$true] %s20_s23 }
   0x3   :  { %s22_s25 = sshll.u32 %s3774_s24, 4  ;;  %s33_s28 = sshll.u32 %s4534_s2, 4  ;;  %s23_s25 = int_to_ptr.vmem [resolvable:$true] %s22_s25  ;;  %s34_s28 = int_to_ptr.hbm [resolvable:$true] %s33_s28 }
   0x4   :  { %s3775_s29 = smov 128   ;;  %s3776_s30 = smov 8  }
   0x5   :  { %28 = dma.hbm_to_vmem [thread:$0]  %s21_s23, 12288, %s23_s25, [#allocation3], %s3775_s29, %s3775_s29, %s3776_s30  }
   0x6   :  { %s3777_s7 = smov [#allocation5]  }
   0x7   :  { %s35_s8 = sshll.u32 %s3777_s7, 4  ;;  %s36_s8 = int_to_ptr.vmem [resolvable:$true] %s35_s8 }
   0x8   :  { %41 = dma.hbm_to_vmem [thread:$0]  %s34_s28, 12288, %s36_s8, [#allocation6], %s3775_s29, %s3775_s29, %s3776_s30  }
   0x9   :  { %3768 = dma.done.wait [#allocation3], 12288  }
   0xa   :  { %3769 = vsyncadd [#allocation3], 4294955008 }
   0xb   :  { %3770 = dma.done.wait [#allocation6], 12288  }
   0xc   :  { %3771 = vsyncadd [#allocation6], 4294955008  ;;  %v2614_v0 = vld [vmem:[#allocation2 + $0x70] sm:$0xf]  ;;  %v3459_v1 = vld [vmem:[#allocation2 + $0x74] sm:$0xf0] }
   0xd   :  { %v2678_v2 = vld [vmem:[#allocation2 + $0xf0] sm:$0xf]  ;;  %v2615_v3 = vor.u32 %v3459_v1, %v2614_v0  ;;  %v3475_v4 = vld [vmem:[#allocation2 + $0xf4] sm:$0xf0]  ;;  %v2606_v11 = vld [vmem:[#allocation2 + $0x60] sm:$0xf] }
   0xe   :  { %v2742_v5 = vld [vmem:[#allocation2 + $0x170] sm:$0xf]  ;;  %v3491_v6 = vld [vmem:[#allocation2 + $0x174] sm:$0xf0]  ;;  %v2679_v7 = vor.u32 %v3475_v4, %v2678_v2  ;;  %v3457_v13 = vld [vmem:[#allocation2 + $0x64] sm:$0xf0] }
   0xf   :  { %v2743_v8 = vor.u32 %v3491_v6, %v2742_v5  ;;  %v2806_v9 = vld [vmem:[#allocation2 + $0x1f0] sm:$0xf]  ;;  %v3507_v10 = vld [vmem:[#allocation2 + $0x1f4] sm:$0xf0]  ;;  %714 = vmatpush.bf16.msra.mxu0 %v2615_v3  ;;  %v2670_v14 = vld [vmem:[#allocation2 + $0xe0] sm:$0xf]  ;;  %v2607_v16 = vor.u32 %v3457_v13, %v2606_v11 }
  0x10   :  { %v2807_v12 = vor.u32 %v3507_v10, %v2806_v9  ;;  %v3473_v15 = vld [vmem:[#allocation2 + $0xe4] sm:$0xf0]  ;;  %733 = vmatpush.bf16.msra.mxu1 %v2679_v7  ;;  %v2734_v18 = vld [vmem:[#allocation2 + $0x160] sm:$0xf]  ;;  %v2598_v23 = vld [vmem:[#allocation2 + $0x50] sm:$0xf] }
  0x11   :  { %752 = vmatpush.bf16.msra.mxu2 %v2743_v8  ;;  %v2671_v17 = vor.u32 %v3473_v15, %v2670_v14  ;;  %v3489_v19 = vld [vmem:[#allocation2 + $0x164] sm:$0xf0]  ;;  %v2798_v20 = vld [vmem:[#allocation2 + $0x1e0] sm:$0xf]  ;;  %v3455_v24 = vld [vmem:[#allocation2 + $0x54] sm:$0xf0] }
  0x12   :  { %771 = vmatpush.bf16.msra.mxu3 %v2807_v12  ;;  %v2735_v21 = vor.u32 %v3489_v19, %v2734_v18  ;;  %v3505_v22 = vld [vmem:[#allocation2 + $0x1e4] sm:$0xf0]  ;;  %v2662_v26 = vld [vmem:[#allocation2 + $0xd0] sm:$0xf]  ;;  %v3471_v27 = vld [vmem:[#allocation2 + $0xd4] sm:$0xf0]  ;;  %v2599_v29 = vor.u32 %v3455_v24, %v2598_v23 }
  0x13   :  { %v2799_v25 = vor.u32 %v3505_v22, %v2798_v20  ;;  %v2726_v28 = vld [vmem:[#allocation2 + $0x150] sm:$0xf]  ;;  %715 = vmatpush.bf16.msra.mxu0 %v2607_v16  ;;  %v3487_v30 = vld [vmem:[#allocation2 + $0x154] sm:$0xf0]  ;;  %v2663_v33 = vor.u32 %v3471_v27, %v2662_v26  ;;  %v2590_v35 = vld [vmem:[#allocation2 + $0x40] sm:$0xf] }
  0x14   :  { %v2790_v31 = vld [vmem:[#allocation2 + $0x1d0] sm:$0xf]  ;;  %v3503_v32 = vld [vmem:[#allocation2 + $0x1d4] sm:$0xf0]  ;;  %734 = vmatpush.bf16.msra.mxu1 %v2671_v17  ;;  %v2727_v34 = vor.u32 %v3487_v30, %v2726_v28  ;;  %v3453_v36 = vld [vmem:[#allocation2 + $0x44] sm:$0xf0] }
  0x15   :  { %753 = vmatpush.bf16.msra.mxu2 %v2735_v21  ;;  %v2654_v37 = vld [vmem:[#allocation2 + $0xc0] sm:$0xf]  ;;  %v2791_v38 = vor.u32 %v3503_v32, %v2790_v31  ;;  %v3469_v39 = vld [vmem:[#allocation2 + $0xc4] sm:$0xf0]  ;;  %v2591_v44 = vor.u32 %v3453_v36, %v2590_v35  ;;  %v2582_v47 = vld [vmem:[#allocation2 + $0x30] sm:$0xf] }
  0x16   :  { %772 = vmatpush.bf16.msra.mxu3 %v2799_v25  ;;  %v2718_v40 = vld [vmem:[#allocation2 + $0x140] sm:$0xf]  ;;  %v3485_v41 = vld [vmem:[#allocation2 + $0x144] sm:$0xf0]  ;;  %v2655_v45 = vor.u32 %v3469_v39, %v2654_v37  ;;  %v3451_v48 = vld [vmem:[#allocation2 + $0x34] sm:$0xf0] }
  0x17   :  { %v2782_v42 = vld [vmem:[#allocation2 + $0x1c0] sm:$0xf]  ;;  %v3501_v43 = vld [vmem:[#allocation2 + $0x1c4] sm:$0xf0]  ;;  %716 = vmatpush.bf16.msra.mxu0 %v2599_v29  ;;  %v2719_v46 = vor.u32 %v3485_v41, %v2718_v40  ;;  %v2646_v49 = vld [vmem:[#allocation2 + $0xb0] sm:$0xf]  ;;  %v2583_v56 = vor.u32 %v3451_v48, %v2582_v47 }
  0x18   :  { %735 = vmatpush.bf16.msra.mxu1 %v2663_v33  ;;  %v2783_v50 = vor.u32 %v3501_v43, %v2782_v42  ;;  %v3467_v51 = vld [vmem:[#allocation2 + $0xb4] sm:$0xf0]  ;;  %v2710_v52 = vld [vmem:[#allocation2 + $0x130] sm:$0xf]  ;;  %v2574_v59 = vld [vmem:[#allocation2 + $0x20] sm:$0xf] }
  0x19   :  { %754 = vmatpush.bf16.msra.mxu2 %v2727_v34  ;;  %v3483_v53 = vld [vmem:[#allocation2 + $0x134] sm:$0xf0]  ;;  %v2774_v54 = vld [vmem:[#allocation2 + $0x1b0] sm:$0xf]  ;;  %v2647_v57 = vor.u32 %v3467_v51, %v2646_v49  ;;  %v3449_v60 = vld [vmem:[#allocation2 + $0x24] sm:$0xf0] }
  0x1a   :  { %773 = vmatpush.bf16.msra.mxu3 %v2791_v38  ;;  %v3499_v55 = vld [vmem:[#allocation2 + $0x1b4] sm:$0xf0]  ;;  %v2711_v58 = vor.u32 %v3483_v53, %v2710_v52  ;;  %v2638_v61 = vld [vmem:[#allocation2 + $0xa0] sm:$0xf]  ;;  %v3465_v63 = vld [vmem:[#allocation2 + $0xa4] sm:$0xf0]  ;;  %v2575_v5 = vor.u32 %v3449_v60, %v2574_v59 }
  0x1b   :  { %717 = vmatpush.bf16.msra.mxu0 %v2591_v44  ;;  %v2775_v62 = vor.u32 %v3499_v55, %v2774_v54  ;;  %v2702_v0 = vld [vmem:[#allocation2 + $0x120] sm:$0xf]  ;;  %v3481_v1 = vld [vmem:[#allocation2 + $0x124] sm:$0xf0]  ;;  %v2566_v4 = vld [vmem:[#allocation2 + $0x10] sm:$0xf]  ;;  %v2639_v9 = vor.u32 %v3465_v63, %v2638_v61 }
  0x1c   :  { %736 = vmatpush.bf16.msra.mxu1 %v2655_v45  ;;  %v2766_v2 = vld [vmem:[#allocation2 + $0x1a0] sm:$0xf]  ;;  %v3497_v3 = vld [vmem:[#allocation2 + $0x1a4] sm:$0xf0]  ;;  %v3447_v6 = vld [vmem:[#allocation2 + $0x14] sm:$0xf0]  ;;  %v2703_v10 = vor.u32 %v3481_v1, %v2702_v0 }
  0x1d   :  { %755 = vmatpush.bf16.msra.mxu2 %v2719_v46  ;;  %v2630_v7 = vld [vmem:[#allocation2 + $0x90] sm:$0xf]  ;;  %v3463_v8 = vld [vmem:[#allocation2 + $0x94] sm:$0xf0]  ;;  %v2767_v14 = vor.u32 %v3497_v3, %v2766_v2  ;;  %v3826_v16 = vld [vmem:[%s4532_s0] sm:$0xff]  ;;  %v2567_v21 = vor.u32 %v3447_v6, %v2566_v4  ;;  %vm76_vm0 = vcmask 1040384  }
  0x1e   :  { %774 = vmatpush.bf16.msra.mxu3 %v2783_v50  ;;  %v2694_v11 = vld [vmem:[#allocation2 + $0x110] sm:$0xf]  ;;  %v3479_v12 = vld [vmem:[#allocation2 + $0x114] sm:$0xf0]  ;;  %v2558_v18 = vld [vmem:[#allocation2] sm:$0xf]  ;;  %v2631_v22 = vor.u32 %v3463_v8, %v2630_v7 }
  0x1f   :  { %718 = vmatpush.bf16.msra.mxu0 %v2583_v56  ;;  %v2758_v13 = vld [vmem:[#allocation2 + $0x190] sm:$0xf]  ;;  %v3495_v15 = vld [vmem:[#allocation2 + $0x194] sm:$0xf0]  ;;  %v3836_v19 = vld [vmem:[%s4532_s0 + $0x8] sm:$0xff]  ;;  %v77_v25 = vrot.slane %v3826_v16, 7  ;;  %v2695_v27 = vor.u32 %v3479_v12, %v2694_v11 }
  0x20   :  { %737 = vmatpush.bf16.msra.mxu1 %v2647_v57  ;;  %v3831_v17 = vld [vmem:[%s4532_s0 + $0x10] sm:$0xff]  ;;  %v3841_v20 = vld [vmem:[%s4532_s0 + $0x18] sm:$0xff]  ;;  %v3445_v23 = vld [vmem:[#allocation2 + $0x4] sm:$0xf0]  ;;  %v78_v29 = vrot.slane %v3836_v19, 7  ;;  %v2759_v31 = vor.u32 %v3495_v15, %v2758_v13  ;;  %vm3778_vm2 = vmmov 1  }
  0x21   :  { %756 = vmatpush.bf16.msra.mxu2 %v2711_v58  ;;  %v2622_v24 = vld [vmem:[#allocation2 + $0x80] sm:$0xf]  ;;  %v79_v26 = vrot.slane %v3831_v17, 7  ;;  %v3461_v28 = vld [vmem:[#allocation2 + $0x84] sm:$0xf0]  ;;  %v81_v30 = vrot.slane %v3841_v20, 7  ;;  %v2559_v38 = vor.u32 %v3445_v23, %v2558_v18  ;;  %vm3849_vm1 = vmneg %vm76_vm0  ;;  %v3867_v58 = vpack.c.bf16 %v3831_v17, %v3826_v16 }
  0x22   :  { %775 = vmatpush.bf16.msra.mxu3 %v2775_v62  ;;  %v2686_v32 = vld [vmem:[#allocation2 + $0x100] sm:$0xf]  ;;  %v3477_v33 = vld [vmem:[#allocation2 + $0x104] sm:$0xf0]  ;;  %v3458_v36 = vld [vmem:[#allocation2 + $0x74] sm:$0xf]  ;;  %v2623_v42 = vor.u32 %v3461_v28, %v2622_v24  ;;  %v3871_v61 = vpack.c.bf16 %v3841_v20, %v3836_v19 }
  0x23   :  { %719 = vmatpush.bf16.msra.mxu0 %v2575_v5  ;;  %v2750_v34 = vld [vmem:[#allocation2 + $0x180] sm:$0xf]  ;;  %v3493_v35 = vld [vmem:[#allocation2 + $0x184] sm:$0xf0]  ;;  %v2616_v37 = vld [vmem:[#allocation2 + $0x78] sm:$0xf0]  ;;  %v80_v39 = vsel %vm76_vm0, %v77_v25, %v79_v26  ;;  %v2687_v43 = vor.u32 %v3477_v33, %v2686_v32  ;;  %v82_v45 = vsel %vm76_vm0, %v78_v29, %v81_v30 }
  0x24   :  { %738 = vmatpush.bf16.msra.mxu1 %v2639_v9  ;;  %v2934_v40 = vld [vmem:[#allocation2 + $0x2f0] sm:$0xf]  ;;  %v3539_v41 = vld [vmem:[#allocation2 + $0x2f4] sm:$0xf0]  ;;  %v2751_v46 = vor.u32 %v3493_v35, %v2750_v34  ;;  %v2619_v47 = vor.u32 %v3458_v36, %v2616_v37  ;;  %v3474_v50 = vld [vmem:[#allocation2 + $0xf4] sm:$0xf]  ;;  %v3854_v51 = vpack.c.bf16 %v80_v39, %v77_v25  ;;  %v3863_v57 = vpack.c.bf16 %v82_v45, %v78_v29 }
  0x25   :  { %757 = vmatpush.bf16.msra.mxu2 %v2703_v10  ;;  %v2870_v48 = vld [vmem:[#allocation2 + $0x270] sm:$0xf]  ;;  %v3523_v49 = vld [vmem:[#allocation2 + $0x274] sm:$0xf0]  ;;  %v2935_v52 = vor.u32 %v3539_v41, %v2934_v40  ;;  %v2680_v53 = vld [vmem:[#allocation2 + $0xf8] sm:$0xf0] }
  0x26   :  { %776 = vmatpush.bf16.msra.mxu3 %v2767_v14  ;;  %v3456_v54 = vld [vmem:[#allocation2 + $0x64] sm:$0xf]  ;;  %v2608_v55 = vld [vmem:[#allocation2 + $0x68] sm:$0xf0]  ;;  %vm3859_vm3 = vmpackc.low %vm3778_vm2, %vm3849_vm1  ;;  %v2871_v62 = vor.u32 %v3523_v49, %v2870_v48  ;;  %v2683_v63 = vor.u32 %v3474_v50, %v2680_v53  ;;  %vm101_vm4 = vcmask 1046528   ;;  %vm1042_vm6 = vcmask 1041409  }
  0x27   :  { %720 = vmatpush.bf16.msra.mxu0 %v2567_v21  ;;  %v2926_v59 = vld [vmem:[#allocation2 + $0x2e0] sm:$0xf]  ;;  %v3537_v60 = vld [vmem:[#allocation2 + $0x2e4] sm:$0xf0]  ;;  %v2611_v0 = vor.u32 %v3456_v54, %v2608_v55  ;;  %v3472_v3 = vld [vmem:[#allocation2 + $0xe4] sm:$0xf] }
  0x28   :  { %739 = vmatpush.bf16.msra.mxu1 %v2631_v22  ;;  %v2862_v1 = vld [vmem:[#allocation2 + $0x260] sm:$0xf]  ;;  %v3521_v2 = vld [vmem:[#allocation2 + $0x264] sm:$0xf0]  ;;  %v2927_v4 = vor.u32 %v3537_v60, %v2926_v59  ;;  %v2672_v5 = vld [vmem:[#allocation2 + $0xe8] sm:$0xf0] }
  0x29   :  { %758 = vmatpush.bf16.msra.mxu2 %v2695_v27  ;;  %v3454_v6 = vld [vmem:[#allocation2 + $0x54] sm:$0xf]  ;;  %v2600_v7 = vld [vmem:[#allocation2 + $0x58] sm:$0xf0]  ;;  %v2854_v8 = vld [vmem:[#allocation2 + $0x250] sm:$0xf]  ;;  %v2863_v11 = vor.u32 %v3521_v2, %v2862_v1  ;;  %v2675_v15 = vor.u32 %v3472_v3, %v2672_v5 }
  0x2a   :  { %777 = vmatpush.bf16.msra.mxu3 %v2759_v31  ;;  %v2918_v9 = vld [vmem:[#allocation2 + $0x2d0] sm:$0xf]  ;;  %v3535_v10 = vld [vmem:[#allocation2 + $0x2d4] sm:$0xf0]  ;;  %v3884_v13 = vld [vmem:[%s4532_s0 + $0x20] sm:$0xff]  ;;  %v2603_v18 = vor.u32 %v3454_v6, %v2600_v7  ;;  %vm1159_vm10 = vcmask 130048  }
  0x2b   :  { %721 = vmatpush.bf16.msra.mxu0 %v2559_v38  ;;  %v3519_v12 = vld [vmem:[#allocation2 + $0x254] sm:$0xf0]  ;;  %v3889_v14 = vld [vmem:[%s4532_s0 + $0x30] sm:$0xff]  ;;  %v3894_v22 = vld [vmem:[%s4532_s0 + $0x28] sm:$0xff]  ;;  %v2919_v24 = vor.u32 %v3535_v10, %v2918_v9  ;;  %v83_v30 = vrot.slane %v3884_v13, 7  ;;  %s3779_s28 = smov [#allocation7]  }
  0x2c   :  { %740 = vmatpush.bf16.msra.mxu1 %v2623_v42  ;;  %v3470_v21 = vld [vmem:[#allocation2 + $0xd4] sm:$0xf]  ;;  %v3899_v23 = vld [vmem:[%s4532_s0 + $0x38] sm:$0xff]  ;;  %v3452_v26 = vld [vmem:[#allocation2 + $0x44] sm:$0xf]  ;;  %v85_v31 = vrot.slane %v3889_v14, 7  ;;  %v2855_v32 = vor.u32 %v3519_v12, %v2854_v8  ;;  %v3913_v1 = vpack.c.bf16 %v3889_v14, %v3884_v13 }
  0x2d   :  { %759 = vmatpush.bf16.msra.mxu2 %v2687_v43  ;;  %v2664_v25 = vld [vmem:[#allocation2 + $0xd8] sm:$0xf0]  ;;  %v2592_v27 = vld [vmem:[#allocation2 + $0x48] sm:$0xf0]  ;;  %v2910_v28 = vld [vmem:[#allocation2 + $0x2c0] sm:$0xf] }
  0x2e   :  { %778 = vmatpush.bf16.msra.mxu3 %v2751_v46  ;;  %2943 = vmatmul.msk.bf16.vlgmr.msra.gmra.mxu0 %vm3859_vm3, %v3854_v51  ;;  %v3533_v29 = vld [vmem:[#allocation2 + $0x2c4] sm:$0xf0]  ;;  %v84_v33 = vrot.slane %v3894_v22, 7  ;;  %v87_v34 = vrot.slane %v3899_v23, 7  ;;  %v2667_v35 = vor.u32 %v3470_v21, %v2664_v25  ;;  %v2595_v36 = vor.u32 %v3452_v26, %v2592_v27  ;;  %v2846_v37 = vld [vmem:[#allocation2 + $0x240] sm:$0xf]  ;;  %vm3939_vm5 = vmpackc.low %vm101_vm4, %vm3778_vm2 }
  0x2f   :  { %2951 = vmatmul.msk.bf16.vlgmr.msra.gmra.mxu1 %vm3859_vm3, %v3863_v57  ;;  %790 = vmatpush.bf16.msrb.mxu0 %v2871_v62  ;;  %v3517_v38 = vld [vmem:[#allocation2 + $0x244] sm:$0xf0]  ;;  %v3468_v39 = vld [vmem:[#allocation2 + $0xc4] sm:$0xf]  ;;  %v2911_v40 = vor.u32 %v3533_v29, %v2910_v28  ;;  %v2656_v41 = vld [vmem:[#allocation2 + $0xc8] sm:$0xf0]  ;;  %v86_v44 = vsel %vm76_vm0, %v83_v30, %v85_v31 }
  0x30   :  { %809 = vmatpush.bf16.msrb.mxu1 %v2935_v52  ;;  %760 = vmatmul.bf16.vlgmr.msra.gmra.mxu2 %v3867_v58  ;;  %v3450_v42 = vld [vmem:[#allocation2 + $0x34] sm:$0xf]  ;;  %v2584_v43 = vld [vmem:[#allocation2 + $0x38] sm:$0xf0]  ;;  %v2902_v45 = vld [vmem:[#allocation2 + $0x2b0] sm:$0xf]  ;;  %v88_v48 = vsel %vm76_vm0, %v84_v33, %v87_v34  ;;  %v2659_v49 = vor.u32 %v3468_v39, %v2656_v41  ;;  %v3907_v55 = vpack.c.bf16 %v86_v44, %v83_v30 }
  0x31   :  { %828 = vmatpush.bf16.msrb.mxu2 %v2619_v47  ;;  %779 = vmatmul.bf16.vlgmr.msra.gmra.mxu3 %v3871_v61  ;;  %v3531_v46 = vld [vmem:[#allocation2 + $0x2b4] sm:$0xf0]  ;;  %v2847_v47 = vor.u32 %v3517_v38, %v2846_v37  ;;  %v2587_v50 = vor.u32 %v3450_v42, %v2584_v43  ;;  %v2838_v52 = vld [vmem:[#allocation2 + $0x230] sm:$0xf]  ;;  %v3466_v54 = vld [vmem:[#allocation2 + $0xb4] sm:$0xf] }
  0x32   :  { %847 = vmatpush.bf16.msrb.mxu3 %v2683_v63  ;;  %v3515_v53 = vld [vmem:[#allocation2 + $0x234] sm:$0xf0]  ;;  %v2903_v59 = vor.u32 %v3531_v46, %v2902_v45  ;;  %v2648_v60 = vld [vmem:[#allocation2 + $0xb8] sm:$0xf0]  ;;  %v3448_v62 = vld [vmem:[#allocation2 + $0x24] sm:$0xf] }
  0x33   :  { %791 = vmatpush.bf16.msrb.mxu0 %v2863_v11  ;;  %v2576_v63 = vld [vmem:[#allocation2 + $0x28] sm:$0xf0]  ;;  %v2894_v2 = vld [vmem:[#allocation2 + $0x2a0] sm:$0xf]  ;;  %v3529_v3 = vld [vmem:[#allocation2 + $0x2a4] sm:$0xf0]  ;;  %v2839_v5 = vor.u32 %v3515_v53, %v2838_v52  ;;  %v2651_v6 = vor.u32 %v3466_v54, %v2648_v60 }
  0x34   :  { %810 = vmatpush.bf16.msrb.mxu1 %v2927_v4  ;;  %v3917_v4 = vpack.c.bf16 %v3899_v23, %v3894_v22  ;;  %v2579_v7 = vor.u32 %v3448_v62, %v2576_v63  ;;  %v2830_v8 = vld [vmem:[#allocation2 + $0x220] sm:$0xf]  ;;  %v3513_v9 = vld [vmem:[#allocation2 + $0x224] sm:$0xf0]  ;;  %v3464_v10 = vld [vmem:[#allocation2 + $0xa4] sm:$0xf]  ;;  %v2895_v11 = vor.u32 %v3529_v3, %v2894_v2 }
  0x35   :  { %829 = vmatpush.bf16.msrb.mxu2 %v2611_v0  ;;  %v3909_v0 = vpack.c.bf16 %v88_v48, %v84_v33  ;;  %v2640_v12 = vld [vmem:[#allocation2 + $0xa8] sm:$0xf0]  ;;  %v2886_v21 = vld [vmem:[#allocation2 + $0x290] sm:$0xf]  ;;  %v2831_v25 = vor.u32 %v3513_v9, %v2830_v8  ;;  %v102_v27 = vrot.slane %v3826_v16, 1  ;;  %v103_v28 = vrot.slane %v3831_v17, 1 }
  0x36   :  { %848 = vmatpush.bf16.msrb.mxu3 %v2675_v15  ;;  %v3446_v15 = vld [vmem:[#allocation2 + $0x14] sm:$0xf]  ;;  %v2822_v26 = vld [vmem:[#allocation2 + $0x210] sm:$0xf]  ;;  %v2643_v29 = vor.u32 %v3464_v10, %v2640_v12  ;;  %v3511_v31 = vld [vmem:[#allocation2 + $0x214] sm:$0xf0] }
  0x37   :  { %792 = vmatpush.bf16.msrb.mxu0 %v2855_v32  ;;  %v3462_v32 = vld [vmem:[#allocation2 + $0x94] sm:$0xf]  ;;  %v2632_v33 = vld [vmem:[#allocation2 + $0x98] sm:$0xf0]  ;;  %v2878_v37 = vld [vmem:[#allocation2 + $0x280] sm:$0xf]  ;;  %v2823_v16 = vor.u32 %v3511_v31, %v2822_v26  ;;  %v104_v2 = vsel %vm101_vm4, %v102_v27, %v103_v28 }
  0x38   :  { %811 = vmatpush.bf16.msrb.mxu1 %v2919_v24  ;;  %v3527_v24 = vld [vmem:[#allocation2 + $0x294] sm:$0xf0]  ;;  %v2814_v38 = vld [vmem:[#allocation2 + $0x200] sm:$0xf]  ;;  %v3525_v39 = vld [vmem:[#allocation2 + $0x284] sm:$0xf0]  ;;  %v2635_v45 = vor.u32 %v3462_v32, %v2632_v33 }
  0x39   :  { %830 = vmatpush.bf16.msrb.mxu2 %v2603_v18  ;;  %v2568_v18 = vld [vmem:[#allocation2 + $0x18] sm:$0xf0]  ;;  %v2887_v34 = vor.u32 %v3527_v24, %v2886_v21  ;;  %v105_v17 = vrot.slane %v3836_v19, 1  ;;  %v106_v42 = vrot.slane %v3841_v20, 1  ;;  %v3506_v43 = vld [vmem:[#allocation2 + $0x1f4] sm:$0xf] }
  0x3a   :  { %849 = vmatpush.bf16.msrb.mxu3 %v2667_v35  ;;  %v2571_v30 = vor.u32 %v3446_v15, %v2568_v18  ;;  %v3444_v35 = vld [vmem:[#allocation2 + $0x4] sm:$0xf]  ;;  %v2872_v41 = vld [vmem:[#allocation2 + $0x278] sm:$0xf0]  ;;  %v3490_v53 = vld [vmem:[#allocation2 + $0x174] sm:$0xf]  ;;  %v3933_v18 = vpack.c.bf16 %v103_v28, %v104_v2 }
  0x3b   :  { %793 = vmatpush.bf16.msrb.mxu0 %v2847_v47  ;;  %v2808_v44 = vld [vmem:[#allocation2 + $0x1f8] sm:$0xf0]  ;;  %v3509_v47 = vld [vmem:[#allocation2 + $0x204] sm:$0xf0]  ;;  %v3460_v48 = vld [vmem:[#allocation2 + $0x84] sm:$0xf]  ;;  %v107_v3 = vsel %vm101_vm4, %v105_v17, %v106_v42 }
  0x3c   :  { %812 = vmatpush.bf16.msrb.mxu1 %v2911_v40  ;;  %v3522_v40 = vld [vmem:[#allocation2 + $0x274] sm:$0xf]  ;;  %v2744_v54 = vld [vmem:[#allocation2 + $0x178] sm:$0xf0]  ;;  %v2811_v60 = vor.u32 %v3506_v43, %v2808_v44  ;;  %v3520_v19 = vld [vmem:[#allocation2 + $0x264] sm:$0xf]  ;;  %v2815_v20 = vor.u32 %v3509_v47, %v2814_v38  ;;  %v3935_v21 = vpack.c.bf16 %v106_v42, %v107_v3 }
  0x3d   :  { %831 = vmatpush.bf16.msrb.mxu2 %v2595_v36  ;;  %v2560_v36 = vld [vmem:[#allocation2 + $0x8] sm:$0xf0]  ;;  %v2875_v52 = vor.u32 %v3522_v40, %v2872_v41  ;;  %v2936_v62 = vld [vmem:[#allocation2 + $0x2f8] sm:$0xf0]  ;;  %v3536_v15 = vld [vmem:[#allocation2 + $0x2e4] sm:$0xf] }
  0x3e   :  { %850 = vmatpush.bf16.msrb.mxu3 %v2659_v49  ;;  %2947 = vmatmul.msk.bf16.gmra.mxu0 %vm3859_vm3, %v3907_v55  ;;  %v2563_v46 = vor.u32 %v3444_v35, %v2560_v36  ;;  %v2624_v49 = vld [vmem:[#allocation2 + $0x88] sm:$0xf0]  ;;  %v2856_v26 = vld [vmem:[#allocation2 + $0x258] sm:$0xf0]  ;;  %v3486_v31 = vld [vmem:[#allocation2 + $0x154] sm:$0xf] }
  0x3f   :  { %2955 = vmatmul.msk.bf16.gmra.mxu1 %vm3859_vm3, %v3909_v0  ;;  %794 = vmatpush.bf16.msrb.mxu0 %v2839_v5  ;;  %v2864_v63 = vld [vmem:[#allocation2 + $0x268] sm:$0xf0]  ;;  %v2627_v5 = vor.u32 %v3460_v48, %v2624_v49  ;;  %v2728_v28 = vld [vmem:[#allocation2 + $0x158] sm:$0xf0]  ;;  %v3534_v36 = vld [vmem:[#allocation2 + $0x2d4] sm:$0xf] }
  0x40   :  { %813 = vmatpush.bf16.msrb.mxu1 %v2903_v59  ;;  %765 = vmatmul.bf16.gmra.mxu2 %v3913_v1  ;;  %v3538_v59 = vld [vmem:[#allocation2 + $0x2f4] sm:$0xf]  ;;  %v2736_v8 = vld [vmem:[#allocation2 + $0x168] sm:$0xf0]  ;;  %v2867_v10 = vor.u32 %v3520_v19, %v2864_v63  ;;  %v2792_v35 = vld [vmem:[#allocation2 + $0x1d8] sm:$0xf0]  ;;  %v2731_v17 = vor.u32 %v3486_v31, %v2728_v28 }
  0x41   :  { %832 = vmatpush.bf16.msrb.mxu2 %v2587_v50  ;;  %784 = vmatmul.bf16.gmra.mxu3 %v3917_v4  ;;  %v2879_v50 = vor.u32 %v3525_v39, %v2878_v37  ;;  %v2939_v9 = vor.u32 %v3538_v59, %v2936_v62  ;;  %v2800_v12 = vld [vmem:[#allocation2 + $0x1e8] sm:$0xf0]  ;;  %v2920_v37 = vld [vmem:[#allocation2 + $0x2d8] sm:$0xf0]  ;;  %v3516_v38 = vld [vmem:[#allocation2 + $0x244] sm:$0xf] }
  0x42   :  { %851 = vmatpush.bf16.msrb.mxu3 %v2651_v6  ;;  %v2747_v6 = vor.u32 %v3490_v53, %v2744_v54  ;;  %v2928_v24 = vld [vmem:[#allocation2 + $0x2e8] sm:$0xf0]  ;;  %v3484_v40 = vld [vmem:[#allocation2 + $0x144] sm:$0xf]  ;;  %v2923_v43 = vor.u32 %v3534_v36, %v2920_v37  ;;  %v3514_v48 = vld [vmem:[#allocation2 + $0x234] sm:$0xf] }
  0x43   :  { %795 = vmatpush.bf16.msrb.mxu0 %v2831_v25  ;;  %v3518_v25 = vld [vmem:[#allocation2 + $0x254] sm:$0xf]  ;;  %v2931_v32 = vor.u32 %v3536_v15, %v2928_v24  ;;  %v2848_v39 = vld [vmem:[#allocation2 + $0x248] sm:$0xf0]  ;;  %v108_v49 = vrot.slane %v3884_v13, 1  ;;  %v3659_v56 = vld [vmem:[%s4536_s4 + $0xe0] sm:$0xff] }
  0x44   :  { %814 = vmatpush.bf16.msrb.mxu1 %v2895_v11  ;;  %v3504_v11 = vld [vmem:[#allocation2 + $0x1e4] sm:$0xf]  ;;  %v2859_v33 = vor.u32 %v3518_v25, %v2856_v26  ;;  %v2720_v41 = vld [vmem:[#allocation2 + $0x148] sm:$0xf0]  ;;  %v2851_v44 = vor.u32 %v3516_v38, %v2848_v39  ;;  %v3482_v59 = vld [vmem:[#allocation2 + $0x134] sm:$0xf] }
  0x45   :  { %833 = vmatpush.bf16.msrb.mxu2 %v2579_v7  ;;  %v3488_v7 = vld [vmem:[#allocation2 + $0x164] sm:$0xf]  ;;  %v2912_v47 = vld [vmem:[#allocation2 + $0x2c8] sm:$0xf0]  ;;  %v2723_v53 = vor.u32 %v3484_v40, %v2720_v41  ;;  %v3498_v63 = vld [vmem:[#allocation2 + $0x1b4] sm:$0xf] }
  0x46   :  { %852 = vmatpush.bf16.msrb.mxu3 %v2643_v29  ;;  %v2739_v29 = vor.u32 %v3488_v7, %v2736_v8  ;;  %v3530_v2 = vld [vmem:[#allocation2 + $0x2b4] sm:$0xf]  ;;  %v2904_v13 = vld [vmem:[#allocation2 + $0x2b8] sm:$0xf0]  ;;  %v3512_v3 = vld [vmem:[#allocation2 + $0x224] sm:$0xf] }
  0x47   :  { %796 = vmatpush.bf16.msrb.mxu0 %v2823_v16  ;;  %v3500_v16 = vld [vmem:[#allocation2 + $0x1c4] sm:$0xf]  ;;  %v2704_v8 = vld [vmem:[#allocation2 + $0x128] sm:$0xf0]  ;;  %v3494_v36 = vld [vmem:[#allocation2 + $0x194] sm:$0xf] }
  0x48   :  { %815 = vmatpush.bf16.msrb.mxu1 %v2887_v34  ;;  %v3502_v34 = vld [vmem:[#allocation2 + $0x1d4] sm:$0xf]  ;;  %v3480_v7 = vld [vmem:[#allocation2 + $0x124] sm:$0xf]  ;;  %v2896_v26 = vld [vmem:[#allocation2 + $0x2a8] sm:$0xf0] }
  0x49   :  { %834 = vmatpush.bf16.msrb.mxu2 %v2571_v30  ;;  %v2803_v30 = vor.u32 %v3504_v11, %v2800_v12  ;;  %v2795_v42 = vor.u32 %v3502_v34, %v2792_v35  ;;  %v3496_v11 = vld [vmem:[#allocation2 + $0x1a4] sm:$0xf]  ;;  %v2768_v12 = vld [vmem:[#allocation2 + $0x1a8] sm:$0xf0]  ;;  %v2707_v31 = vor.u32 %v3480_v7, %v2704_v8  ;;  %v2760_v37 = vld [vmem:[#allocation2 + $0x198] sm:$0xf0] }
  0x4a   :  { %853 = vmatpush.bf16.msrb.mxu3 %v2635_v45  ;;  %v2784_v45 = vld [vmem:[#allocation2 + $0x1c8] sm:$0xf0]  ;;  %v3528_v15 = vld [vmem:[#allocation2 + $0x2a4] sm:$0xf]  ;;  %v2771_v28 = vor.u32 %v3496_v11, %v2768_v12  ;;  %v3526_v38 = vld [vmem:[#allocation2 + $0x294] sm:$0xf] }
  0x4b   :  { %797 = vmatpush.bf16.msrb.mxu0 %v2815_v20  ;;  %v2787_v54 = vor.u32 %v3500_v16, %v2784_v45  ;;  %v2776_v20 = vld [vmem:[#allocation2 + $0x1b8] sm:$0xf0]  ;;  %v2899_v34 = vor.u32 %v3528_v15, %v2896_v26  ;;  %v3508_v40 = vld [vmem:[#allocation2 + $0x204] sm:$0xf]  ;;  %v2816_v41 = vld [vmem:[#allocation2 + $0x208] sm:$0xf0] }
  0x4c   :  { %816 = vmatpush.bf16.msrb.mxu1 %v2879_v50  ;;  %v111_v50 = vrot.slane %v3894_v22, 1  ;;  %v2888_v39 = vld [vmem:[#allocation2 + $0x298] sm:$0xf0]  ;;  %v2688_v45 = vld [vmem:[#allocation2 + $0x108] sm:$0xf0]  ;;  %v1012_v7 = vld [vmem:[%s4536_s4 + $0x30] sm:$0xff] }
  0x4d   :  { %835 = vmatpush.bf16.msrb.mxu2 %v2563_v46  ;;  %v3532_v46 = vld [vmem:[#allocation2 + $0x2c4] sm:$0xf]  ;;  %v1011_v12 = vld [vmem:[%s4536_s4 + $0x28] sm:$0xff]  ;;  %v1009_v26 = vld [vmem:[%s4536_s4 + $0x18] sm:$0xff]  ;;  %s2540_s29 = sshll.u32 %s3779_s28, 4  ;;  %s2542_s8 = sshll.u32 %s4538_s6, 4  ;;  %s2541_s29 = int_to_ptr.vmem [resolvable:$true] %s2540_s29  ;;  %s2543_s8 = int_to_ptr.hbm [resolvable:$true] %s2542_s8 }
  0x4e   :  { %854 = vmatpush.bf16.msrb.mxu3 %v2627_v5  ;;  %2958 = vmatmul.msk.bf16.vlgmr.msrb.gmra.mxu0 %vm3939_vm5, %v3933_v18  ;;  %v2915_v62 = vor.u32 %v3532_v46, %v2912_v47  ;;  %v3492_v46 = vld [vmem:[#allocation2 + $0x184] sm:$0xf]  ;;  %v2752_v47 = vld [vmem:[#allocation2 + $0x188] sm:$0xf0]  ;;  %s3780_s11 = smov 256   ;;  %s3781_s6 = smov 16  }
  0x4f   :  { %866 = vmatpush.bf16.msra.mxu0 %v2747_v6  ;;  %2964 = vmatmul.msk.bf16.vlgmr.msrb.gmra.mxu1 %vm3939_vm5, %v3935_v21  ;;  %v2779_v6 = vor.u32 %v3498_v63, %v2776_v20 }
  0x50   :  { %885 = vmatpush.bf16.msra.mxu1 %v2811_v60  ;;  %2971 = vmatmul.msk.bf16.vlgmr.msrb.gmra.mxu2 %vm3859_vm3, %v3854_v51  ;;  %v2840_v51 = vld [vmem:[#allocation2 + $0x238] sm:$0xf0] }
  0x51   :  { %904 = vmatpush.bf16.msra.mxu2 %v2875_v52  ;;  %2979 = vmatmul.msk.bf16.vlgmr.msrb.gmra.mxu3 %vm3859_vm3, %v3863_v57  ;;  %v109_v57 = vrot.slane %v3889_v14, 1  ;;  %v112_v52 = vrot.slane %v3899_v23, 1  ;;  %v2712_v60 = vld [vmem:[#allocation2 + $0x138] sm:$0xf0]  ;;  %v2843_v19 = vor.u32 %v3514_v48, %v2840_v51  ;;  %v2832_v14 = vld [vmem:[#allocation2 + $0x228] sm:$0xf0] }
  0x52   :  { %923 = vmatpush.bf16.msra.mxu3 %v2939_v9  ;;  %v2715_v5 = vor.u32 %v3482_v59, %v2712_v60  ;;  %v2907_v9 = vor.u32 %v3530_v2, %v2904_v13  ;;  %v3524_v48 = vld [vmem:[#allocation2 + $0x284] sm:$0xf]  ;;  %v2880_v51 = vld [vmem:[#allocation2 + $0x288] sm:$0xf0]  ;;  %v1016_v13 = vld [vmem:[%s4536_s4 + $0x50] sm:$0xff] }
  0x53   :  { %867 = vmatpush.bf16.msra.mxu0 %v2739_v29  ;;  %v110_v22 = vsel %vm101_vm4, %v108_v49, %v109_v57  ;;  %v113_v23 = vsel %vm101_vm4, %v111_v50, %v112_v52  ;;  %v3510_v29 = vld [vmem:[#allocation2 + $0x214] sm:$0xf]  ;;  %v2755_v49 = vor.u32 %v3492_v46, %v2752_v47  ;;  %v1019_v60 = vld [vmem:[%s4536_s4 + $0x68] sm:$0xff] }
  0x54   :  { %886 = vmatpush.bf16.msra.mxu1 %v2803_v30  ;;  %v2960_v24 = vpack.c.bf16 %v109_v57, %v110_v22  ;;  %v2966_v25 = vpack.c.bf16 %v112_v52, %v113_v23  ;;  %v2824_v30 = vld [vmem:[#allocation2 + $0x218] sm:$0xf0]  ;;  %v1014_v22 = vld [vmem:[%s4536_s4 + $0x40] sm:$0xff] }
  0x55   :  { %905 = vmatpush.bf16.msra.mxu2 %v2867_v10  ;;  %v2835_v10 = vor.u32 %v3512_v3, %v2832_v14  ;;  %v2827_v35 = vor.u32 %v3510_v29, %v2824_v30  ;;  %v1015_v14 = vld [vmem:[%s4536_s4 + $0x48] sm:$0xff]  ;;  %v1013_v23 = vld [vmem:[%s4536_s4 + $0x38] sm:$0xff] }
  0x56   :  { %924 = vmatpush.bf16.msra.mxu3 %v2931_v32  ;;  %v3478_v32 = vld [vmem:[#allocation2 + $0x114] sm:$0xf] }
  0x57   :  { %868 = vmatpush.bf16.msra.mxu0 %v2731_v17  ;;  %v2763_v17 = vor.u32 %v3494_v36, %v2760_v37  ;;  %v1007_v37 = vld [vmem:[%s4536_s4 + $0x8] sm:$0xff] }
  0x58   :  { %887 = vmatpush.bf16.msra.mxu1 %v2795_v42  ;;  %v3476_v42 = vld [vmem:[#allocation2 + $0x104] sm:$0xf] }
  0x59   :  { %906 = vmatpush.bf16.msra.mxu2 %v2859_v33  ;;  %v2696_v33 = vld [vmem:[#allocation2 + $0x118] sm:$0xf0] }
  0x5a   :  { %925 = vmatpush.bf16.msra.mxu3 %v2923_v43  ;;  %v2699_v16 = vor.u32 %v3478_v32, %v2696_v33  ;;  %v2891_v43 = vor.u32 %v3526_v38, %v2888_v39  ;;  %v1008_v32 = vld [vmem:[%s4536_s4 + $0x10] sm:$0xff]  ;;  %v1006_v39 = vld [vmem:[%s4536_s4] sm:$0xff] }
  0x5b   :  { %869 = vmatpush.bf16.msra.mxu0 %v2723_v53 }
  0x5c   :  { %888 = vmatpush.bf16.msra.mxu1 %v2787_v54  ;;  %v1020_v54 = vld [vmem:[%s4536_s4 + $0x70] sm:$0xff] }
  0x5d   :  { %907 = vmatpush.bf16.msra.mxu2 %v2851_v44  ;;  %v2819_v44 = vor.u32 %v3508_v40, %v2816_v41 }
  0x5e   :  { %926 = vmatpush.bf16.msra.mxu3 %v2915_v62  ;;  %2961 = vmatmul.msk.bf16.gmra.mxu0 %vm3939_vm5, %v2960_v24  ;;  %v1018_v62 = vld [vmem:[%s4536_s4 + $0x60] sm:$0xff] }
  0x5f   :  { %870 = vmatpush.bf16.msra.mxu0 %v2715_v5  ;;  %2967 = vmatmul.msk.bf16.gmra.mxu1 %vm3939_vm5, %v2966_v25 }
  0x60   :  { %889 = vmatpush.bf16.msra.mxu1 %v2779_v6  ;;  %2975 = vmatmul.msk.bf16.gmra.mxu2 %vm3859_vm3, %v3907_v55  ;;  %v2691_v55 = vor.u32 %v3476_v42, %v2688_v45 }
  0x61   :  { %908 = vmatpush.bf16.msra.mxu2 %v2843_v19  ;;  %2983 = vmatmul.msk.bf16.gmra.mxu3 %vm3859_vm3, %v3909_v0  ;;  %v2883_v0 = vor.u32 %v3524_v48, %v2880_v51  ;;  %v1017_v19 = vld [vmem:[%s4536_s4 + $0x58] sm:$0xff] }
  0x62   :  { %927 = vmatpush.bf16.msra.mxu3 %v2907_v9 }
  0x63   :  { %871 = vmatpush.bf16.msra.mxu0 %v2707_v31 }
  0x64   :  { %890 = vmatpush.bf16.msra.mxu1 %v2771_v28 }
  0x65   :  { %909 = vmatpush.bf16.msra.mxu2 %v2835_v10 }
  0x66   :  { %928 = vmatpush.bf16.msra.mxu3 %v2899_v34 }
  0x67   :  { %872 = vmatpush.bf16.msra.mxu0 %v2699_v16 }
  0x68   :  { %891 = vmatpush.bf16.msra.mxu1 %v2763_v17 }
  0x69   :  { %910 = vmatpush.bf16.msra.mxu2 %v2827_v35 }
  0x6a   :  { %929 = vmatpush.bf16.msra.mxu3 %v2891_v43 }
  0x6b   :  { %873 = vmatpush.bf16.msra.mxu0 %v2691_v55 }
  0x6c   :  { %892 = vmatpush.bf16.msra.mxu1 %v2755_v49 }
  0x6d   :  { %911 = vmatpush.bf16.msra.mxu2 %v2819_v44 }
  0x6e   :  { %930 = vmatpush.bf16.msra.mxu3 %v2883_v0  ;;  %874 = vmatmul.bf16.vlgmr.msra.gmra.mxu0 %v3867_v58  ;;  %v1037_v0 = vld [vmem:[%s4536_s4 + $0xf8] sm:$0xff] }
  0x6f   :  { %893 = vmatmul.bf16.vlgmr.msra.gmra.mxu1 %v3871_v61 }
  0x70   :  { %2986 = vmatmul.msk.bf16.vlgmr.msra.gmra.mxu2 %vm3939_vm5, %v3933_v18  ;;  %1067 = vmatpush.msrb.mxu1 %v1037_v0 }
  0x71   :  { %2992 = vmatmul.msk.bf16.vlgmr.msra.gmra.mxu3 %vm3939_vm5, %v3935_v21  ;;  %v1021_v21 = vld [vmem:[%s4536_s4 + $0x78] sm:$0xff] }
  0x72   :  { %1047 = vmatpush.msrb.mxu0 %v1021_v21  ;;  %1096 = vmatpush.msrb.mxu2 %v1021_v21 }
  0x73   :  { %1116 = vmatpush.msrb.mxu3 %v1037_v0  ;;  %v1026_v0 = vld [vmem:[%s4536_s4 + $0xa0] sm:$0xff] }
  0x74   :  { %1048 = vmatpush.msrb.mxu0 %v1020_v54  ;;  %1097 = vmatpush.msrb.mxu2 %v1020_v54 }
  0x76   :  { %1049 = vmatpush.msrb.mxu0 %v1019_v60  ;;  %1098 = vmatpush.msrb.mxu2 %v1019_v60 }
  0x78   :  { %1050 = vmatpush.msrb.mxu0 %v1018_v62  ;;  %1099 = vmatpush.msrb.mxu2 %v1018_v62  ;;  %v1034_v62 = vld [vmem:[%s4536_s4 + $0xe0] sm:$0xff] }
  0x7a   :  { %1051 = vmatpush.msrb.mxu0 %v1017_v19  ;;  %1100 = vmatpush.msrb.mxu2 %v1017_v19 }
  0x7c   :  { %1052 = vmatpush.msrb.mxu0 %v1016_v13  ;;  %1101 = vmatpush.msrb.mxu2 %v1016_v13 }
  0x7e   :  { %879 = vmatmul.bf16.gmra.mxu0 %v3913_v1  ;;  %1102 = vmatpush.msrb.mxu2 %v1015_v14 }
  0x7f   :  { %898 = vmatmul.bf16.gmra.mxu1 %v3917_v4  ;;  %1053 = vmatpush.msrb.mxu0 %v1015_v14 }
  0x80   :  { %2989 = vmatmul.msk.bf16.gmra.mxu2 %vm3939_vm5, %v2960_v24 }
  0x81   :  { %2995 = vmatmul.msk.bf16.gmra.mxu3 %vm3939_vm5, %v2966_v25  ;;  %1054 = vmatpush.msrb.mxu0 %v1014_v22  ;;  %v1010_v25 = vld [vmem:[%s4536_s4 + $0x20] sm:$0xff] }
  0x82   :  { %1103 = vmatpush.msrb.mxu2 %v1014_v22 }
  0x83   :  { %1055 = vmatpush.msrb.mxu0 %v1013_v23 }
  0x84   :  { %1104 = vmatpush.msrb.mxu2 %v1013_v23 }
  0x85   :  { %1056 = vmatpush.msrb.mxu0 %v1012_v7 }
  0x86   :  { %1105 = vmatpush.msrb.mxu2 %v1012_v7 }
  0x87   :  { %1057 = vmatpush.msrb.mxu0 %v1011_v12 }
  0x88   :  { %1106 = vmatpush.msrb.mxu2 %v1011_v12 }
  0x89   :  { %1058 = vmatpush.msrb.mxu0 %v1010_v25 }
  0x8a   :  { %1107 = vmatpush.msrb.mxu2 %v1010_v25  ;;  %v1030_v25 = vld [vmem:[%s4536_s4 + $0xc0] sm:$0xff] }
  0x8b   :  { %1059 = vmatpush.msrb.mxu0 %v1009_v26 }
  0x8c   :  { %1108 = vmatpush.msrb.mxu2 %v1009_v26 }
  0x8d   :  { %1060 = vmatpush.msrb.mxu0 %v1008_v32 }
  0x8e   :  { %1109 = vmatpush.msrb.mxu2 %v1008_v32  ;;  %v1029_v32 = vld [vmem:[%s4536_s4 + $0xb8] sm:$0xff] }
  0x8f   :  { %1061 = vmatpush.msrb.mxu0 %v1007_v37 }
  0x90   :  { %1110 = vmatpush.msrb.mxu2 %v1007_v37 }
  0x91   :  { %1062 = vmatpush.msrb.mxu0 %v1006_v39 }
  0x92   :  { %1111 = vmatpush.msrb.mxu2 %v1006_v39 }
  0xab   :  { %v723_v58 = vpop.f32.mrf.mxu0 }
  0xac   :  { %v742_v61 = vpop.f32.mrf.mxu1 }
  0xad   :  { %v743_v10 = vadd.f32 %v742_v61, %v723_v58 }
  0xb3   :  { %v761_v57 = vpop.f32.mrf.mxu2  ;;  %v725_v52 = vpop.f32.mrf.mxu0 }
  0xb4   :  { %v780_v50 = vpop.f32.mrf.mxu3  ;;  %v744_v18 = vpop.f32.mrf.mxu1  ;;  %v762_v15 = vadd.f32 %v761_v57, %v743_v10  ;;  %v1036_v57 = vld [vmem:[%s4536_s4 + $0xf0] sm:$0xff] }
  0xb5   :  { %v745_v11 = vadd.f32 %v744_v18, %v725_v52  ;;  %1068 = vmatpush.msrb.mxu1 %v1036_v57  ;;  %1117 = vmatpush.msrb.mxu3 %v1036_v57  ;;  %v1024_v57 = vld [vmem:[%s4536_s4 + $0x90] sm:$0xff] }
  0xb6   :  { %v781_v29 = vadd.f32 %v780_v50, %v762_v15 }
  0xbb   :  { %v763_v53 = vpop.f32.mrf.mxu2  ;;  %v3988_v4 = vpop.f32.mrf.mxu0 }
  0xbc   :  { %v782_v1 = vpop.f32.mrf.mxu3  ;;  %v3993_v59 = vpop.f32.mrf.mxu1  ;;  %v764_v24 = vadd.f32 %v763_v53, %v745_v11  ;;  %v1035_v53 = vld [vmem:[%s4536_s4 + $0xe8] sm:$0xff] }
  0xbd   :  { %v748_v40 = vadd.f32 %v3993_v59, %v3988_v4  ;;  %1069 = vmatpush.msrb.mxu1 %v1035_v53  ;;  %1118 = vmatpush.msrb.mxu3 %v1035_v53 }
  0xbe   :  { %v783_v30 = vadd.f32 %v782_v1, %v764_v24 }
  0xbf   :  { %1070 = vmatpush.msrb.mxu1 %v1034_v62  ;;  %1119 = vmatpush.msrb.mxu3 %v1034_v62 }
  0xc3   :  { %v766_v63 = vpop.f32.mrf.mxu2  ;;  %v730_v2 = vpop.f32.mrf.mxu0 }
  0xc4   :  { %v4004_v20 = vpop.f32.mrf.mxu3  ;;  %v749_v3 = vpop.f32.mrf.mxu1  ;;  %v767_v16 = vadd.f32 %v766_v63, %v748_v40 }
  0xc5   :  { %v750_v46 = vadd.f32 %v749_v3, %v730_v2  ;;  %v1032_v2 = vld [vmem:[%s4536_s4 + $0xd0] sm:$0xff] }
  0xc6   :  { %v786_v51 = vadd.f32 %v4004_v20, %v767_v16  ;;  %v1033_v20 = vld [vmem:[%s4536_s4 + $0xd8] sm:$0xff] }
  0xc7   :  { %1071 = vmatpush.msrb.mxu1 %v1033_v20  ;;  %1120 = vmatpush.msrb.mxu3 %v1033_v20 }
  0xc9   :  { %1072 = vmatpush.msrb.mxu1 %v1032_v2  ;;  %1121 = vmatpush.msrb.mxu3 %v1032_v2 }
  0xcb   :  { %v768_v5 = vpop.f32.mrf.mxu2  ;;  %v799_v8 = vpop.f32.mrf.mxu0 }
  0xcc   :  { %v787_v6 = vpop.f32.mrf.mxu3  ;;  %v818_v9 = vpop.f32.mrf.mxu1  ;;  %v800_v35 = vadd.f32 %v799_v8, %v781_v29  ;;  %v769_v55 = vadd.f32 %v768_v5, %v750_v46 }
  0xce   :  { %v4047_v41 = vadd.f32 %v818_v9, %v800_v35  ;;  %v788_v50 = vadd.f32 %v787_v6, %v769_v55  ;;  %v1031_v9 = vld [vmem:[%s4536_s4 + $0xc8] sm:$0xff] }
  0xcf   :  { %1073 = vmatpush.msrb.mxu1 %v1031_v9  ;;  %1122 = vmatpush.msrb.mxu3 %v1031_v9 }
  0xd0   :  { %v970_v47 = vmul.f32 %v4047_v41, %v4047_v41 }
  0xd1   :  { %1074 = vmatpush.msrb.mxu1 %v1030_v25  ;;  %1123 = vmatpush.msrb.mxu3 %v1030_v25 }
  0xd3   :  { %v4030_v31 = vpop.f32.mrf.mxu2  ;;  %v801_v33 = vpop.f32.mrf.mxu0  ;;  %1075 = vmatpush.msrb.mxu1 %v1029_v32  ;;  %1124 = vmatpush.msrb.mxu3 %v1029_v32 }
  0xd4   :  { %v4032_v28 = vpop.f32.mrf.mxu3  ;;  %v820_v34 = vpop.f32.mrf.mxu1  ;;  %v802_v36 = vadd.f32 %v801_v33, %v783_v30 }
  0xd6   :  { %v4040_v38 = vadd.f32 %v820_v34, %v802_v36  ;;  %v1028_v36 = vld [vmem:[%s4536_s4 + $0xb0] sm:$0xff] }
  0xd7   :  { %1076 = vmatpush.msrb.mxu1 %v1028_v36  ;;  %1125 = vmatpush.msrb.mxu3 %v1028_v36 }
  0xd8   :  { %v972_v17 = vmul.f32 %v4040_v38, %v4040_v38  ;;  %v942_v48 = vadd.f32 %v4040_v38, %v4047_v41 }
  0xda   :  { %v978_v49 = vadd.f32 %v972_v17, %v970_v47  ;;  %v943_v58 = vrot.slane %v942_v48, 4 }
  0xdb   :  { %v4051_v42 = vpop.f32.mrf.mxu2  ;;  %v804_v44 = vpop.f32.mrf.mxu0 }
  0xdc   :  { %v4053_v43 = vpop.f32.mrf.mxu3  ;;  %v823_v45 = vpop.f32.mrf.mxu1  ;;  %v805_v61 = vadd.f32 %v804_v44, %v786_v51  ;;  %v979_v52 = vrot.slane %v978_v49, 4  ;;  %v944_v54 = vadd.f32 %v943_v58, %v942_v48  ;;  %v1027_v44 = vld [vmem:[%s4536_s4 + $0xa8] sm:$0xff] }
  0xdd   :  { %v859_v46 = vadd.f32 %v4053_v43, %v4051_v42  ;;  %1077 = vmatpush.msrb.mxu1 %v1027_v44  ;;  %1126 = vmatpush.msrb.mxu3 %v1027_v44  ;;  %v1025_v43 = vld [vmem:[%s4536_s4 + $0x98] sm:$0xff] }
  0xde   :  { %v4073_v59 = vadd.f32 %v823_v45, %v805_v61  ;;  %v980_v19 = vadd.f32 %v979_v52, %v978_v49  ;;  %v945_v13 = vrot.slane %v944_v54, 2  ;;  %v857_v45 = vadd.f32 %v4032_v28, %v4030_v31  ;;  %v1023_v52 = vld [vmem:[%s4536_s4 + $0x88] sm:$0xff] }
  0xdf   :  { %1078 = vmatpush.msrb.mxu1 %v1026_v0  ;;  %1127 = vmatpush.msrb.mxu3 %v1026_v0 }
  0xe0   :  { %v974_v3 = vmul.f32 %v4073_v59, %v4073_v59  ;;  %v981_v23 = vrot.slane %v980_v19, 2  ;;  %v946_v12 = vadd.f32 %v945_v13, %v944_v54 }
  0xe1   :  { %1079 = vmatpush.msrb.mxu1 %v1025_v43  ;;  %1128 = vmatpush.msrb.mxu3 %v1025_v43 }
  0xe2   :  { %v982_v30 = vadd.f32 %v981_v23, %v980_v19  ;;  %v947_v35 = vrot.slane %v946_v12, 1 }
  0xe3   :  { %v4066_v18 = vpop.f32.mrf.mxu2  ;;  %v806_v1 = vpop.f32.mrf.mxu0  ;;  %1080 = vmatpush.msrb.mxu1 %v1024_v57  ;;  %1129 = vmatpush.msrb.mxu3 %v1024_v57 }
  0xe4   :  { %v4068_v21 = vpop.f32.mrf.mxu3  ;;  %v825_v4 = vpop.f32.mrf.mxu1  ;;  %v807_v60 = vadd.f32 %v806_v1, %v788_v50  ;;  %v983_v16 = vrot.slane %v982_v30, 1  ;;  %v948_v51 = vadd.f32 %v947_v35, %v946_v12 }
  0xe5   :  { %1081 = vmatpush.msrb.mxu1 %v1023_v52  ;;  %1130 = vmatpush.msrb.mxu3 %v1023_v52 }
  0xe6   :  { %v4078_v63 = vadd.f32 %v825_v4, %v807_v60  ;;  %v984_v28 = vadd.f32 %v983_v16, %v982_v30  ;;  %v1022_v60 = vld [vmem:[%s4536_s4 + $0x80] sm:$0xff] }
  0xe7   :  { %1082 = vmatpush.msrb.mxu1 %v1022_v60  ;;  %1131 = vmatpush.msrb.mxu3 %v1022_v60  ;;  %v1158_v60 = vld [vmem:[%s4537_s5 + $0x18] sm:$0xff] }
  0xe8   :  { %v956_v14 = vadd.f32 %v4078_v63, %v4073_v59  ;;  %v976_v22 = vmul.f32 %v4078_v63, %v4078_v63 }
  0xe9   :  { %1240 = vmatpush.msra.mxu3 %v1158_v60  ;;  %1197 = vmatpush.msra.mxu1 %v1158_v60  ;;  %v3599_v60 = vld [vmem:[#allocation5 + $0x1d4] sm:$0xf0] }
  0xea   :  { %v957_v5 = vrot.slane %v956_v14, 4  ;;  %v992_v6 = vadd.f32 %v976_v22, %v974_v3  ;;  %v862_v3 = vadd.f32 %v4068_v21, %v4066_v18 }
  0xeb   :  { %v4092_v7 = vpop.f32.mrf.mxu2  ;;  %v875_v10 = vpop.f32.mrf.mxu0 }
  0xec   :  { %v4094_v8 = vpop.f32.mrf.mxu3  ;;  %v894_v11 = vpop.f32.mrf.mxu1  ;;  %v958_v15 = vadd.f32 %v957_v5, %v956_v14  ;;  %v993_v24 = vrot.slane %v992_v6, 4  ;;  %v876_v58 = vadd.f32 %v875_v10, %v857_v45 }
  0xed   :  { %v864_v9 = vadd.f32 %v4094_v8, %v4092_v7 }
  0xee   :  { %v959_v26 = vrot.slane %v958_v15, 2  ;;  %v994_v29 = vadd.f32 %v993_v24, %v992_v6  ;;  %v895_v53 = vadd.f32 %v894_v11, %v876_v58 }
  0xf0   :  { %v960_v33 = vadd.f32 %v959_v26, %v958_v15  ;;  %v995_v34 = vrot.slane %v994_v29, 2 }
  0xf2   :  { %v961_v40 = vrot.slane %v960_v33, 1  ;;  %v996_v17 = vadd.f32 %v995_v34, %v994_v29 }
  0xf3   :  { %v913_v37 = vpop.f32.mrf.mxu2  ;;  %v877_v47 = vpop.f32.mrf.mxu0 }
  0xf4   :  { %v932_v39 = vpop.f32.mrf.mxu3  ;;  %v896_v48 = vpop.f32.mrf.mxu1  ;;  %v962_v55 = vadd.f32 %v961_v40, %v960_v33  ;;  %v997_v49 = vrot.slane %v996_v17, 1  ;;  %v878_v61 = vadd.f32 %v877_v47, %v859_v46  ;;  %v914_v62 = vadd.f32 %v913_v37, %v895_v53 }
  0xf6   :  { %v1043_v31 = vsel %vm1042_vm6, %v962_v55, %v948_v51  ;;  %v998_v42 = vadd.f32 %v997_v49, %v996_v17  ;;  %v897_v1 = vadd.f32 %v896_v48, %v878_v61  ;;  %v4136_v14 = vadd.f32 %v932_v39, %v914_v62  ;;  %v1157_v62 = vld [vmem:[%s4537_s5 + $0x10] sm:$0xff] }
  0xf7   :  { %1063 = vmatmul.f32.vlgmr.msrb.gmra.mxu0 %v1043_v31  ;;  %1220 = vmatpush.msra.mxu2 %v1157_v62 }
  0xf8   :  { %v1092_v50 = vsel %vm1042_vm6, %v998_v42, %v984_v28  ;;  %v971_v10 = vmul.f32 %v4136_v14, %v4136_v14  ;;  %1177 = vmatpush.msra.mxu0 %v1157_v62 }
  0xf9   :  { %1112 = vmatmul.f32.vlgmr.msrb.gmra.mxu2 %v1092_v50 }
  0xfb   :  { %v915_v4 = vpop.f32.mrf.mxu2  ;;  %v880_v20 = vpop.f32.mrf.mxu0 }
  0xfc   :  { %v934_v54 = vpop.f32.mrf.mxu3  ;;  %v916_v19 = vadd.f32 %v915_v4, %v897_v1  ;;  %v899_v13 = vpop.f32.mrf.mxu1  ;;  %v881_v23 = vadd.f32 %v880_v20, %v862_v3  ;;  %v1155_v20 = vld [vmem:[%s4537_s5] sm:$0xff] }
  0xfd   :  { %1178 = vmatpush.msra.mxu0 %v1155_v20  ;;  %1221 = vmatpush.msra.mxu2 %v1155_v20  ;;  %v3551_v20 = vld [vmem:[#allocation5 + $0x54] sm:$0xf0] }
  0xfe   :  { %v4132_v2 = vadd.f32 %v934_v54, %v916_v19  ;;  %v900_v18 = vadd.f32 %v899_v13, %v881_v23  ;;  %v1156_v13 = vld [vmem:[%s4537_s5 + $0x8] sm:$0xff] }
  0xff   :  { %1241 = vmatpush.msra.mxu3 %v1156_v13  ;;  %1198 = vmatpush.msra.mxu1 %v1156_v13  ;;  %v3106_v13 = vld [vmem:[#allocation5 + $0xd0] sm:$0xf] }
 0x100   :  { %v973_v22 = vmul.f32 %v4132_v2, %v4132_v2  ;;  %v949_v11 = vadd.f32 %v4132_v2, %v4136_v14 }
 0x102   :  { %v985_v15 = vadd.f32 %v973_v22, %v971_v10  ;;  %v950_v24 = vrot.slane %v949_v11, 4  ;;  %v3587_v10 = vld [vmem:[#allocation5 + $0x174] sm:$0xf0] }
 0x103   :  { %v918_v5 = vpop.f32.mrf.mxu2  ;;  %v882_v12 = vpop.f32.mrf.mxu0 }
 0x104   :  { %v937_v6 = vpop.f32.mrf.mxu3  ;;  %v883_v21 = vadd.f32 %v882_v12, %v864_v9  ;;  %v919_v25 = vadd.f32 %v918_v5, %v900_v18  ;;  %v901_v26 = vpop.f32.mrf.mxu1  ;;  %v986_v29 = vrot.slane %v985_v15, 4  ;;  %v951_v33 = vadd.f32 %v950_v24, %v949_v11  ;;  %v3186_v9 = vld [vmem:[#allocation5 + $0x170] sm:$0xf] }
 0x105   :  { %v3250_v11 = vld [vmem:[#allocation5 + $0x1f0] sm:$0xf]  ;;  %v3187_v12 = vor.u32 %v3587_v10, %v3186_v9  ;;  %v3226_v10 = vld [vmem:[#allocation5 + $0x1c0] sm:$0xf] }
 0x106   :  { %v902_v30 = vadd.f32 %v901_v26, %v883_v21  ;;  %v4146_v34 = vadd.f32 %v937_v6, %v919_v25  ;;  %v987_v35 = vadd.f32 %v986_v29, %v985_v15  ;;  %v952_v37 = vrot.slane %v951_v33, 2  ;;  %v3603_v15 = vld [vmem:[#allocation5 + $0x1f4] sm:$0xf0]  ;;  %v3058_v18 = vld [vmem:[#allocation5 + $0x70] sm:$0xf] }
 0x107   :  { %v3555_v21 = vld [vmem:[#allocation5 + $0x74] sm:$0xf0]  ;;  %v3251_v26 = vor.u32 %v3603_v15, %v3250_v11  ;;  %1996 = vmatpush.bf16.msrb.mxu2 %v3187_v12  ;;  %v3597_v11 = vld [vmem:[#allocation5 + $0x1c4] sm:$0xf0]  ;;  %v3034_v15 = vld [vmem:[#allocation5 + $0x40] sm:$0xf] }
 0x108   :  { %v975_v39 = vmul.f32 %v4146_v34, %v4146_v34  ;;  %v988_v17 = vrot.slane %v987_v35, 2  ;;  %v953_v46 = vadd.f32 %v952_v37, %v951_v33  ;;  %v3059_v29 = vor.u32 %v3555_v21, %v3058_v18  ;;  %v3549_v18 = vld [vmem:[#allocation5 + $0x44] sm:$0xf0]  ;;  %v3098_v21 = vld [vmem:[#allocation5 + $0xc0] sm:$0xf] }
 0x109   :  { %v3227_v12 = vor.u32 %v3597_v11, %v3226_v10  ;;  %v3557_v10 = vld [vmem:[#allocation5 + $0x84] sm:$0xf0] }
 0x10a   :  { %v989_v49 = vadd.f32 %v988_v17, %v987_v35  ;;  %v954_v61 = vrot.slane %v953_v46, 1  ;;  %v3242_v35 = vld [vmem:[#allocation5 + $0x1e0] sm:$0xf]  ;;  %1958 = vmatpush.bf16.msrb.mxu0 %v3059_v29  ;;  %v3553_v17 = vld [vmem:[#allocation5 + $0x64] sm:$0xf0] }
 0x10b   :  { %v920_v32 = vpop.f32.mrf.mxu2  ;;  %v3579_v29 = vld [vmem:[#allocation5 + $0x134] sm:$0xf0] }
 0x10c   :  { %v921_v7 = vadd.f32 %v920_v32, %v902_v30  ;;  %v939_v8 = vpop.f32.mrf.mxu3  ;;  %v990_v28 = vrot.slane %v989_v49, 1  ;;  %v955_v43 = vadd.f32 %v954_v61, %v953_v46  ;;  %v3122_v30 = vld [vmem:[#allocation5 + $0xf0] sm:$0xf]  ;;  %v3571_v32 = vld [vmem:[#allocation5 + $0xf4] sm:$0xf0] }
 0x10d   :  { %v3123_v33 = vor.u32 %v3571_v32, %v3122_v30  ;;  %v3114_v46 = vld [vmem:[#allocation5 + $0xe0] sm:$0xf] }
 0x10e   :  { %v4148_v36 = vadd.f32 %v939_v8, %v921_v7  ;;  %v991_v53 = vadd.f32 %v990_v28, %v989_v49  ;;  %v3178_v7 = vld [vmem:[#allocation5 + $0x160] sm:$0xf]  ;;  %v3585_v8 = vld [vmem:[#allocation5 + $0x164] sm:$0xf0] }
 0x110   :  { %v963_v40 = vadd.f32 %v4148_v36, %v4146_v34  ;;  %v977_v16 = vmul.f32 %v4148_v36, %v4148_v36 }
 0x112   :  { %v964_v44 = vrot.slane %v963_v40, 4  ;;  %v999_v45 = vadd.f32 %v977_v16, %v975_v39  ;;  %v3179_v39 = vor.u32 %v3585_v8, %v3178_v7  ;;  %v3050_v16 = vld [vmem:[#allocation5 + $0x60] sm:$0xf]  ;;  %v3595_v7 = vld [vmem:[#allocation5 + $0x1b4] sm:$0xf0] }
 0x114   :  { %v965_v47 = vadd.f32 %v964_v44, %v963_v40  ;;  %v1000_v48 = vrot.slane %v999_v45, 4  ;;  %v3601_v40 = vld [vmem:[#allocation5 + $0x1e4] sm:$0xf0]  ;;  %1997 = vmatpush.bf16.msrb.mxu2 %v3179_v39  ;;  %v3090_v39 = vld [vmem:[#allocation5 + $0xb0] sm:$0xf] }
 0x115   :  { %v3243_v44 = vor.u32 %v3601_v40, %v3242_v35  ;;  %v3026_v35 = vld [vmem:[#allocation5 + $0x30] sm:$0xf] }
 0x116   :  { %v966_v51 = vrot.slane %v965_v47, 2  ;;  %v1001_v55 = vadd.f32 %v1000_v48, %v999_v45  ;;  %v3051_v45 = vor.u32 %v3553_v17, %v3050_v16  ;;  %v3563_v16 = vld [vmem:[#allocation5 + $0xb4] sm:$0xf0]  ;;  %v3146_v17 = vld [vmem:[#allocation5 + $0x120] sm:$0xf] }
 0x118   :  { %v967_v0 = vadd.f32 %v966_v51, %v965_v47  ;;  %v1002_v58 = vrot.slane %v1001_v55, 2  ;;  %v3569_v47 = vld [vmem:[#allocation5 + $0xe4] sm:$0xf0]  ;;  %1959 = vmatpush.bf16.msrb.mxu0 %v3051_v45  ;;  %v3091_v45 = vor.u32 %v3563_v16, %v3090_v39  ;;  %v3116_v16 = vld [vmem:[#allocation5 + $0xe8] sm:$0xf0] }
 0x119   :  { %v3115_v51 = vor.u32 %v3569_v47, %v3114_v46  ;;  %v3210_v47 = vld [vmem:[#allocation5 + $0x1a0] sm:$0xf] }
 0x11a   :  { %v968_v31 = vrot.slane %v967_v0, 1  ;;  %v1003_v42 = vadd.f32 %v1002_v58, %v1001_v55 }
 0x11c   :  { %v969_v57 = vadd.f32 %v968_v31, %v967_v0  ;;  %v1004_v50 = vrot.slane %v1003_v42, 1  ;;  %v3644_v31 = vld [vmem:[%s4535_s3] ss:$0 sm:$0xff] }
 0x11e   :  { %v1044_v52 = vsel %vm1042_vm6, %v969_v57, %v955_v43  ;;  %v1005_v1 = vadd.f32 %v1004_v50, %v1003_v42  ;;  %v3645_v57 = vld [vmem:[%s4535_s3 + $0x1] ss:$0 sm:$0xff] }
 0x11f   :  { %1083 = vmatmul.f32.vlgmr.msrb.gmra.mxu1 %v1044_v52 }
 0x120   :  { %v1093_v4 = vsel %vm1042_vm6, %v1005_v1, %v991_v53  ;;  %1977 = vmatpush.bf16.msrb.mxu1 %v3123_v33  ;;  %v3170_v53 = vld [vmem:[#allocation5 + $0x150] sm:$0xf]  ;;  %v3583_v1 = vld [vmem:[#allocation5 + $0x154] sm:$0xf0] }
 0x121   :  { %1132 = vmatmul.f32.vlgmr.msrb.gmra.mxu3 %v1093_v4  ;;  %v3234_v4 = vld [vmem:[#allocation5 + $0x1d0] sm:$0xf] }
 0x122   :  { %2015 = vmatpush.bf16.msrb.mxu3 %v3251_v26  ;;  %v3235_v62 = vor.u32 %v3599_v60, %v3234_v4  ;;  %v3154_v26 = vld [vmem:[#allocation5 + $0x130] sm:$0xf]  ;;  %v3559_v60 = vld [vmem:[#allocation5 + $0x94] sm:$0xf0] }
 0x123   :  { %v3155_v32 = vor.u32 %v3579_v29, %v3154_v26  ;;  %v3218_v33 = vld [vmem:[#allocation5 + $0x1b0] sm:$0xf] }
 0x124   :  { %1978 = vmatpush.bf16.msrb.mxu1 %v3115_v51  ;;  %v3219_v8 = vor.u32 %v3595_v7, %v3218_v33  ;;  %v3074_v4 = vld [vmem:[#allocation5 + $0x90] sm:$0xf]  ;;  %v3635_v7 = vld [vmem:[#allocation5 + $0x2f4] sm:$0xf0] }
 0x125   :  { %v3314_v29 = vld [vmem:[#allocation5 + $0x270] sm:$0xf] }
 0x126   :  { %2016 = vmatpush.bf16.msrb.mxu3 %v3243_v44  ;;  %v3577_v44 = vld [vmem:[#allocation5 + $0x124] sm:$0xf0] }
 0x127   :  { %v3147_v46 = vor.u32 %v3577_v44, %v3146_v17  ;;  %v3306_v17 = vld [vmem:[#allocation5 + $0x260] sm:$0xf] }
 0x12a   :  { %2017 = vmatpush.bf16.msrb.mxu3 %v3235_v62  ;;  %v3130_v62 = vld [vmem:[#allocation5 + $0x100] sm:$0xf] }
 0x12e   :  { %2018 = vmatpush.bf16.msrb.mxu3 %v3227_v12 }
 0x132   :  { %2019 = vmatpush.bf16.msrb.mxu3 %v3219_v8  ;;  %v3552_v8 = vld [vmem:[#allocation5 + $0x64] sm:$0xf] }
 0x174   :  { %v1064_v19 = vpop.f32.mrf.mxu0 }
 0x17c   :  { %v1113_v23 = vpop.f32.mrf.mxu2 }
 0x19c   :  { %v1084_v54 = vpop.f32.mrf.mxu1 }
 0x19d   :  { %v1085_v3 = vadd.f32 %v1084_v54, %v1064_v19  ;;  %v3171_v54 = vor.u32 %v3583_v1, %v3170_v53  ;;  %v3042_v19 = vld [vmem:[#allocation5 + $0x50] sm:$0xf]  ;;  %v3543_v1 = vld [vmem:[#allocation5 + $0x14] sm:$0xf0] }
 0x19e   :  { %v3010_v53 = vld [vmem:[#allocation5 + $0x10] sm:$0xf] }
 0x19f   :  { %v1087_v22 = vmul.f32 0.00390625, %v1085_v3  ;;  %1998 = vmatpush.bf16.msrb.mxu2 %v3171_v54  ;;  %v3043_v3 = vor.u32 %v3551_v20, %v3042_v19  ;;  %v3011_v54 = vor.u32 %v3543_v1, %v3010_v53  ;;  %v3573_v19 = vld [vmem:[#allocation5 + $0x104] sm:$0xf0]  ;;  %v3075_v20 = vor.u32 %v3559_v60, %v3074_v4  ;;  %v3036_v4 = vld [vmem:[#allocation5 + $0x48] sm:$0xf0] }
 0x1a1   :  { %v1137_v24 = vmul.f32 %v1087_v22, %v1087_v22  ;;  %1960 = vmatpush.bf16.msrb.mxu0 %v3043_v3  ;;  %v3194_v3 = vld [vmem:[#allocation5 + $0x180] sm:$0xf] }
 0x1a4   :  { %v1133_v5 = vpop.f32.mrf.mxu3 }
 0x1a5   :  { %v1134_v6 = vadd.f32 %v1133_v5, %v1113_v23  ;;  %v3567_v23 = vld [vmem:[#allocation5 + $0xd4] sm:$0xf0]  ;;  %v3162_v5 = vld [vmem:[#allocation5 + $0x140] sm:$0xf] }
 0x1a7   :  { %v1136_v25 = vmul.f32 0.00390625, %v1134_v6  ;;  %v3107_v6 = vor.u32 %v3567_v23, %v3106_v13  ;;  %v3131_v13 = vor.u32 %v3573_v19, %v3130_v62  ;;  %v3589_v23 = vld [vmem:[#allocation5 + $0x184] sm:$0xf0] }
 0x1a9   :  { %v1138_v37 = vsub.f32 %v1136_v25, %v1137_v24  ;;  %1979 = vmatpush.bf16.msrb.mxu1 %v3107_v6  ;;  %v3035_v24 = vor.u32 %v3549_v18, %v3034_v15  ;;  %v3565_v25 = vld [vmem:[#allocation5 + $0xc4] sm:$0xf0]  ;;  %v3554_v15 = vld [vmem:[#allocation5 + $0x74] sm:$0xf]  ;;  %v3060_v18 = vld [vmem:[#allocation5 + $0x78] sm:$0xf0] }
 0x1aa   :  { %v3099_v30 = vor.u32 %v3565_v25, %v3098_v21  ;;  %v3541_v6 = vld [vmem:[#allocation5 + $0x4] sm:$0xf0]  ;;  %v3570_v21 = vld [vmem:[#allocation5 + $0xf4] sm:$0xf]  ;;  %v3124_v25 = vld [vmem:[#allocation5 + $0xf8] sm:$0xf0] }
 0x1ab   :  { %v1139_v48 = vadd.f32 1e-05, %v1138_v37  ;;  %1961 = vmatpush.bf16.msrb.mxu0 %v3035_v24  ;;  %v3547_v37 = vld [vmem:[#allocation5 + $0x34] sm:$0xf0]  ;;  %v3063_v24 = vor.u32 %v3554_v15, %v3060_v18  ;;  %v3127_v26 = vor.u32 %v3570_v21, %v3124_v25  ;;  %v3354_v15 = vld [vmem:[#allocation5 + $0x2c0] sm:$0xf] }
 0x1ac   :  { %v3027_v40 = vor.u32 %v3547_v37, %v3026_v35  ;;  %v3052_v35 = vld [vmem:[#allocation5 + $0x68] sm:$0xf0]  ;;  %v3629_v18 = vld [vmem:[#allocation5 + $0x2c4] sm:$0xf0]  ;;  %v3546_v21 = vld [vmem:[#allocation5 + $0x34] sm:$0xf] }
 0x1ad   :  { %3648 = vrsqrt.f32 %v1139_v48  ;;  %vm1146_vm8 = vweird.f32 %v1139_v48  ;;  %1980 = vmatpush.bf16.msrb.mxu1 %v3099_v30  ;;  %v3619_v30 = vld [vmem:[#allocation5 + $0x274] sm:$0xf0]  ;;  %v3055_v39 = vor.u32 %v3552_v8, %v3052_v35  ;;  %v3355_v25 = vor.u32 %v3629_v18, %v3354_v15 }
 0x1ae   :  { %v3315_v33 = vor.u32 %v3619_v30, %v3314_v29  ;;  %v3562_v29 = vld [vmem:[#allocation5 + $0xb4] sm:$0xf]  ;;  %v3092_v30 = vld [vmem:[#allocation5 + $0xb8] sm:$0xf0] }
 0x1af   :  { %1962 = vmatpush.bf16.msrb.mxu0 %v3027_v40  ;;  %v3568_v40 = vld [vmem:[#allocation5 + $0xe4] sm:$0xf]  ;;  %v3095_v8 = vor.u32 %v3562_v29, %v3092_v30  ;;  %v3542_v30 = vld [vmem:[#allocation5 + $0x14] sm:$0xf] }
 0x1b0   :  { %v3119_v44 = vor.u32 %v3568_v40, %v3116_v16  ;;  %v3282_v40 = vld [vmem:[#allocation5 + $0x230] sm:$0xf]  ;;  %v3611_v16 = vld [vmem:[#allocation5 + $0x234] sm:$0xf0] }
 0x1b1   :  { %1981 = vmatpush.bf16.msrb.mxu1 %v3091_v45  ;;  %v3617_v45 = vld [vmem:[#allocation5 + $0x264] sm:$0xf0] }
 0x1b3   :  { %v3649_v55 = vpop.eup %3648 }
 0x1b4   :  { %v1141_v49 = vmul.f32 %v3649_v55, %v1139_v48  ;;  %vm1147_vm7 = vweird.f32 %v3649_v55  ;;  %v3593_v48 = vld [vmem:[#allocation5 + $0x1a4] sm:$0xf0] }
 0x1b5   :  { %vm1148_vm9 = vmor %vm1146_vm8, %vm1147_vm7  ;;  %v3211_v51 = vor.u32 %v3593_v48, %v3210_v47  ;;  %v3633_v47 = vld [vmem:[#allocation5 + $0x2e4] sm:$0xf0]  ;;  %v3307_v48 = vor.u32 %v3617_v45, %v3306_v17  ;;  %v3346_v17 = vld [vmem:[#allocation5 + $0x2b0] sm:$0xf] }
 0x1b6   :  { %v1142_v0 = vmul.f32 %v3649_v55, %v1141_v49  ;;  %v3545_v49 = vld [vmem:[#allocation5 + $0x24] sm:$0xf0] }
 0x1b7   :  { %2020 = vmatpush.bf16.msrb.mxu3 %v3211_v51 }
 0x1b8   :  { %v1143_v58 = vmul.f32 0.5, %v1142_v0  ;;  %v3082_v0 = vld [vmem:[#allocation5 + $0xa0] sm:$0xf] }
 0x1ba   :  { %v1144_v61 = vsub.f32 1.5, %v1143_v58 }
 0x1bc   :  { %v1145_v28 = vmul.f32 %v3649_v55, %v1144_v61  ;;  %v3561_v61 = vld [vmem:[#allocation5 + $0xa4] sm:$0xf0] }
 0x1be   :  { %v1149_v42 = vsel %vm1148_vm9, %v3649_v55, %v1145_v28  ;;  %v3018_v55 = vld [vmem:[#allocation5 + $0x20] sm:$0xf]  ;;  %v3575_v28 = vld [vmem:[#allocation5 + $0x114] sm:$0xf0] }
 0x1bf   :  { %v1151_v43 = vmul.f32 %v3644_v31, %v1149_v42  ;;  %v3019_v58 = vor.u32 %v3545_v49, %v3018_v55  ;;  %v3138_v31 = vld [vmem:[#allocation5 + $0x110] sm:$0xf]  ;;  %v3083_v42 = vor.u32 %v3561_v61, %v3082_v0  ;;  %v3550_v55 = vld [vmem:[#allocation5 + $0x54] sm:$0xf]  ;;  %v3044_v49 = vld [vmem:[#allocation5 + $0x58] sm:$0xf0] }
 0x1c0   :  { %v3566_v0 = vld [vmem:[#allocation5 + $0xd4] sm:$0xf]  ;;  %v3108_v61 = vld [vmem:[#allocation5 + $0xd8] sm:$0xf0] }
 0x1c1   :  { %2996 = vmatmul.msk.f32.vlgmr.msra.gmra.mxu0 %vm1159_vm10, %v1151_v43  ;;  %2997 = vmatmul.msk.f32.vlgmr.msra.gmra.mxu1 %vm1159_vm10, %v1151_v43  ;;  %v1152_v50 = vmul.f32 %v1151_v43, %v1087_v22  ;;  %v3581_v22 = vld [vmem:[#allocation5 + $0x144] sm:$0xf0]  ;;  %v3139_v43 = vor.u32 %v3575_v28, %v3138_v31  ;;  %v3298_v31 = vld [vmem:[#allocation5 + $0x250] sm:$0xf]  ;;  %v3615_v28 = vld [vmem:[#allocation5 + $0x254] sm:$0xf0] }
 0x1c2   :  { %v3163_v9 = vor.u32 %v3581_v22, %v3162_v5  ;;  %1963 = vmatpush.bf16.msrb.mxu0 %v3019_v58  ;;  %1982 = vmatpush.bf16.msrb.mxu1 %v3083_v42  ;;  %v3002_v5 = vld [vmem:[#allocation5] sm:$0xf]  ;;  %v3195_v22 = vor.u32 %v3589_v23, %v3194_v3  ;;  %v3047_v58 = vor.u32 %v3550_v55, %v3044_v49  ;;  %v3613_v3 = vld [vmem:[#allocation5 + $0x244] sm:$0xf0] }
 0x1c3   :  { %v1154_v52 = vsub.f32 %v3645_v57, %v1152_v50  ;;  %v3202_v57 = vld [vmem:[#allocation5 + $0x190] sm:$0xf]  ;;  %v3591_v50 = vld [vmem:[#allocation5 + $0x194] sm:$0xf0]  ;;  %v3003_v11 = vor.u32 %v3541_v6, %v3002_v5  ;;  %v3299_v1 = vor.u32 %v3615_v28, %v3298_v31 }
 0x1c4   :  { %1999 = vmatpush.bf16.msrb.mxu2 %v3163_v9  ;;  %v3066_v9 = vld [vmem:[#allocation5 + $0x80] sm:$0xf] }
 0x1c5   :  { %2998 = vmatmul.msk.f32.vlgmr.msra.gmra.mxu2 %vm1159_vm10, %v1154_v52  ;;  %2999 = vmatmul.msk.f32.vlgmr.msra.gmra.mxu3 %vm1159_vm10, %v1154_v52  ;;  %v3203_v52 = vor.u32 %v3591_v50, %v3202_v57  ;;  %v3067_v12 = vor.u32 %v3557_v10, %v3066_v9  ;;  %v3362_v57 = vld [vmem:[#allocation5 + $0x2d0] sm:$0xf]  ;;  %v3631_v50 = vld [vmem:[#allocation5 + $0x2d4] sm:$0xf0] }
 0x1c6   :  { %1964 = vmatpush.bf16.msrb.mxu0 %v3011_v54  ;;  %1983 = vmatpush.bf16.msrb.mxu1 %v3075_v20  ;;  %v3564_v54 = vld [vmem:[#allocation5 + $0xc4] sm:$0xf]  ;;  %v3363_v62 = vor.u32 %v3631_v50, %v3362_v57  ;;  %v3100_v20 = vld [vmem:[#allocation5 + $0xc8] sm:$0xf0]  ;;  %v3609_v57 = vld [vmem:[#allocation5 + $0x224] sm:$0xf0] }
 0x1c7   :  { %2021 = vmatpush.bf16.msrb.mxu3 %v3203_v52  ;;  %v3548_v52 = vld [vmem:[#allocation5 + $0x44] sm:$0xf]  ;;  %v3103_v5 = vor.u32 %v3564_v54, %v3100_v20 }
 0x1c8   :  { %2000 = vmatpush.bf16.msrb.mxu2 %v3155_v32  ;;  %v3378_v32 = vld [vmem:[#allocation5 + $0x2f0] sm:$0xf]  ;;  %v3039_v19 = vor.u32 %v3548_v52, %v3036_v4 }
 0x1c9   :  { %v3379_v37 = vor.u32 %v3635_v7, %v3378_v32 }
 0x1ca   :  { %1965 = vmatpush.bf16.msrb.mxu0 %v3003_v11  ;;  %1984 = vmatpush.bf16.msrb.mxu1 %v3067_v12 }
 0x1cb   :  { %2022 = vmatpush.bf16.msrb.mxu3 %v3195_v22 }
 0x1cc   :  { %2001 = vmatpush.bf16.msrb.mxu2 %v3147_v46  ;;  %v3370_v46 = vld [vmem:[#allocation5 + $0x2e0] sm:$0xf] }
 0x1cd   :  { %v3371_v51 = vor.u32 %v3633_v47, %v3370_v46  ;;  %v3283_v46 = vor.u32 %v3611_v16, %v3282_v40  ;;  %v3627_v47 = vld [vmem:[#allocation5 + $0x2b4] sm:$0xf0] }
 0x1ce   :  { %2034 = vmatpush.bf16.msra.mxu0 %v3315_v33  ;;  %2053 = vmatpush.bf16.msra.mxu1 %v3379_v37 }
 0x1cf   :  { %2091 = vmatpush.bf16.msra.mxu3 %v3127_v26  ;;  %v3028_v26 = vld [vmem:[#allocation5 + $0x38] sm:$0xf0] }
 0x1d0   :  { %2002 = vmatpush.bf16.msrb.mxu2 %v3139_v43  ;;  %v3111_v43 = vor.u32 %v3566_v0, %v3108_v61  ;;  %v3031_v7 = vor.u32 %v3546_v21, %v3028_v26  ;;  %v3347_v0 = vor.u32 %v3627_v47, %v3346_v17  ;;  %v3607_v17 = vld [vmem:[#allocation5 + $0x214] sm:$0xf0]  ;;  %v3540_v47 = vld [vmem:[#allocation5 + $0x4] sm:$0xf] }
 0x1d2   :  { %2035 = vmatpush.bf16.msra.mxu0 %v3307_v48  ;;  %2054 = vmatpush.bf16.msra.mxu1 %v3371_v51  ;;  %v3544_v48 = vld [vmem:[#allocation5 + $0x24] sm:$0xf]  ;;  %v3020_v51 = vld [vmem:[#allocation5 + $0x28] sm:$0xf0] }
 0x1d3   :  { %2092 = vmatpush.bf16.msra.mxu3 %v3119_v44  ;;  %v3023_v28 = vor.u32 %v3544_v48, %v3020_v51  ;;  %v3004_v48 = vld [vmem:[#allocation5 + $0x8] sm:$0xf0]  ;;  %v3556_v51 = vld [vmem:[#allocation5 + $0x84] sm:$0xf] }
 0x1d4   :  { %2003 = vmatpush.bf16.msrb.mxu2 %v3131_v13  ;;  %v3290_v13 = vld [vmem:[#allocation5 + $0x240] sm:$0xf] }
 0x1d5   :  { %v3291_v9 = vor.u32 %v3613_v3, %v3290_v13 }
 0x1d6   :  { %2036 = vmatpush.bf16.msra.mxu0 %v3299_v1  ;;  %2055 = vmatpush.bf16.msra.mxu1 %v3363_v62 }
 0x1d7   :  { %2093 = vmatpush.bf16.msra.mxu3 %v3111_v43  ;;  %v3274_v43 = vld [vmem:[#allocation5 + $0x220] sm:$0xf] }
 0x1d8   :  { %2072 = vmatpush.bf16.msra.mxu2 %v3063_v24 }
 0x1da   :  { %2037 = vmatpush.bf16.msra.mxu0 %v3291_v9  ;;  %2056 = vmatpush.bf16.msra.mxu1 %v3355_v25  ;;  %v3625_v25 = vld [vmem:[#allocation5 + $0x2a4] sm:$0xf0] }
 0x1db   :  { %2094 = vmatpush.bf16.msra.mxu3 %v3103_v5 }
 0x1dc   :  { %2073 = vmatpush.bf16.msra.mxu2 %v3055_v39 }
 0x1de   :  { %2038 = vmatpush.bf16.msra.mxu0 %v3283_v46  ;;  %2057 = vmatpush.bf16.msra.mxu1 %v3347_v0 }
 0x1df   :  { %2095 = vmatpush.bf16.msra.mxu3 %v3095_v8 }
 0x1e0   :  { %2074 = vmatpush.bf16.msra.mxu2 %v3047_v58 }
 0x1e4   :  { %2075 = vmatpush.bf16.msra.mxu2 %v3039_v19 }
 0x1e8   :  { %2076 = vmatpush.bf16.msra.mxu2 %v3031_v7 }
 0x1ec   :  { %2077 = vmatpush.bf16.msra.mxu2 %v3023_v28 }
 0x23e   :  { %v1200_v42 = vpop.f32.mrf.mxu1  ;;  %v1180_v60 = vpop.f32.mrf.mxu0 }
 0x23f   :  { %v1248_v53 = vrot.slane %v1200_v42, 7  ;;  %v3084_v42 = vld [vmem:[#allocation5 + $0xa8] sm:$0xf0] }
 0x241   :  { %v1250_v23 = vsel %vm1042_vm6, %v1180_v60, %v1248_v53  ;;  %v1249_v6 = vsel %vm76_vm0, %v1180_v60, %v1248_v53 }
 0x242   :  { %v1251_v22 = vrot.slane %v1250_v23, 1  ;;  %v1252_v10 = vperm.slane %v1249_v6, 0  ;;  %v1253_v11 = vperm.slane %v1249_v6, 1 }
 0x244   :  { %v1254_v12 = vperm.slane %v1251_v22, 0  ;;  %v4182_v32 = vperm.slane %v1251_v22, 1  ;;  %v1260_v35 = vmul.f32 %v1252_v10, %v4047_v41  ;;  %v1261_v37 = vmul.f32 %v1253_v11, %v4136_v14  ;;  %v3560_v14 = vld [vmem:[#allocation5 + $0xa4] sm:$0xf] }
 0x245   :  { %v1262_v58 = vmul.f32 %v1252_v10, %v4040_v38  ;;  %v1263_v61 = vmul.f32 %v1253_v11, %v4132_v2  ;;  %v3087_v60 = vor.u32 %v3560_v14, %v3084_v42  ;;  %v3275_v38 = vor.u32 %v3609_v57, %v3274_v43  ;;  %v3322_v42 = vld [vmem:[#allocation5 + $0x280] sm:$0xf]  ;;  %v3621_v43 = vld [vmem:[#allocation5 + $0x284] sm:$0xf0]  ;;  %v3618_v57 = vld [vmem:[#allocation5 + $0x274] sm:$0xf] }
 0x246   :  { %v1264_v31 = vmul.f32 %v1254_v12, %v4073_v59  ;;  %v1266_v50 = vmul.f32 %v1254_v12, %v4078_v63  ;;  %v1265_v12 = vmul.f32 %v4182_v32, %v4146_v34  ;;  %v1267_v15 = vmul.f32 %v4182_v32, %v4148_v36  ;;  %v3012_v34 = vld [vmem:[#allocation5 + $0x18] sm:$0xf0] }
 0x247   :  { %2096 = vmatpush.bf16.msra.mxu3 %v3087_v60  ;;  %2039 = vmatpush.bf16.msra.mxu0 %v3275_v38 }
 0x248   :  { %v1243_v24 = vpop.f32.mrf.mxu3  ;;  %v1223_v39 = vpop.f32.mrf.mxu2 }
 0x249   :  { %v1270_v33 = vrot.slane %v1243_v24, 7  ;;  %v3338_v24 = vld [vmem:[#allocation5 + $0x2a0] sm:$0xf] }
 0x24a   :  { %v3339_v16 = vor.u32 %v3625_v25, %v3338_v24  ;;  %v3616_v24 = vld [vmem:[#allocation5 + $0x264] sm:$0xf]  ;;  %v3308_v25 = vld [vmem:[#allocation5 + $0x268] sm:$0xf0] }
 0x24b   :  { %v1271_v44 = vsel %vm76_vm0, %v1223_v39, %v1270_v33  ;;  %v1272_v45 = vsel %vm1042_vm6, %v1223_v39, %v1270_v33  ;;  %v3558_v33 = vld [vmem:[#allocation5 + $0x94] sm:$0xf] }
 0x24c   :  { %v1273_v55 = vrot.slane %v1272_v45, 1  ;;  %v1274_v49 = vperm.slane %v1271_v44, 0  ;;  %v1275_v41 = vperm.slane %v1271_v44, 1  ;;  %v3330_v44 = vld [vmem:[#allocation5 + $0x290] sm:$0xf]  ;;  %2058 = vmatpush.bf16.msra.mxu1 %v3339_v16 }
 0x24d   :  { %v3623_v45 = vld [vmem:[#allocation5 + $0x294] sm:$0xf0] }
 0x24e   :  { %v1276_v52 = vperm.slane %v1273_v55, 0  ;;  %v1282_v53 = vadd.f32 %v1274_v49, %v1260_v35  ;;  %v1283_v1 = vadd.f32 %v1275_v41, %v1261_v37  ;;  %v1284_v4 = vadd.f32 %v1274_v49, %v1262_v58  ;;  %v3076_v35 = vld [vmem:[#allocation5 + $0x98] sm:$0xf0]  ;;  %v3266_v37 = vld [vmem:[#allocation5 + $0x210] sm:$0xf] }
 0x24f   :  { %v1285_v54 = vadd.f32 %v1275_v41, %v1263_v61  ;;  %v1277_v23 = vperm.slane %v1273_v55, 1  ;;  %v3068_v55 = vld [vmem:[#allocation5 + $0x88] sm:$0xf0]  ;;  %v3258_v49 = vld [vmem:[#allocation5 + $0x200] sm:$0xf]  ;;  %v3079_v28 = vor.u32 %v3558_v33, %v3076_v35  ;;  %v3331_v38 = vor.u32 %v3623_v45, %v3330_v44 }
 0x250   :  { %v1298_v62 = vmul.f32 0.01, %v1282_v53  ;;  %v1299_v2 = vmul.f32 0.01, %v1283_v1  ;;  %vm1290_vm11 = vcmp.gt.f32.partialorder %v1282_v53, 0.0  ;;  %vm1291_vm12 = vcmp.gt.f32.partialorder %v1283_v1, 0.0 }
 0x251   :  { %v1300_v59 = vmul.f32 0.01, %v1284_v4  ;;  %v1301_v19 = vmul.f32 0.01, %v1285_v54  ;;  %vm1292_vm13 = vcmp.gt.f32.partialorder %v1284_v4, 0.0  ;;  %vm1293_vm14 = vcmp.gt.f32.partialorder %v1285_v54, 0.0  ;;  %2097 = vmatpush.bf16.msra.mxu3 %v3079_v28  ;;  %2059 = vmatpush.bf16.msra.mxu1 %v3331_v38 }
 0x252   :  { %v4192_v63 = vsel %vm1290_vm11, %v1282_v53, %v1298_v62  ;;  %v4194_v20 = vsel %vm1291_vm12, %v1283_v1, %v1299_v2  ;;  %v1286_v13 = vadd.f32 %v1276_v52, %v1264_v31  ;;  %v1288_v3 = vadd.f32 %v1276_v52, %v1266_v50  ;;  %v3605_v58 = vld [vmem:[#allocation5 + $0x204] sm:$0xf0]  ;;  %v3316_v53 = vld [vmem:[#allocation5 + $0x278] sm:$0xf0]  ;;  %v3634_v1 = vld [vmem:[#allocation5 + $0x2f4] sm:$0xf] }
 0x253   :  { %v4196_v5 = vsel %vm1292_vm13, %v1284_v4, %v1300_v59  ;;  %v1322_v22 = vrot.slane %v4192_v63, 7  ;;  %v4199_v6 = vsel %vm1293_vm14, %v1285_v54, %v1301_v19  ;;  %v1323_v11 = vrot.slane %v4194_v20, 7  ;;  %v3380_v4 = vld [vmem:[#allocation5 + $0x2f8] sm:$0xf0]  ;;  %v3586_v62 = vld [vmem:[#allocation5 + $0x174] sm:$0xf] }
 0x254   :  { %v1324_v9 = vrot.slane %v4196_v5, 7  ;;  %v4204_v10 = vpack.c.bf16 %v4196_v5, %v4192_v63  ;;  %v1326_v18 = vrot.slane %v4199_v6, 7  ;;  %v4214_v21 = vpack.c.bf16 %v4199_v6, %v4194_v20  ;;  %v3188_v2 = vld [vmem:[#allocation5 + $0x178] sm:$0xf0]  ;;  %v3180_v33 = vld [vmem:[#allocation5 + $0x168] sm:$0xf0] }
 0x255   :  { %vm1294_vm15 = vcmp.gt.f32.partialorder %v1286_v13, 0.0  ;;  %vm1296_vm1 = vcmp.gt.f32.partialorder %v1288_v3, 0.0  ;;  %v1302_v29 = vmul.f32 0.01, %v1286_v13  ;;  %v1304_v7 = vmul.f32 0.01, %v1288_v3 }
 0x256   :  { %2004 = vmatmul.bf16.vlgmr.msrb.gmra.mxu2 %v4204_v10  ;;  %v1325_v26 = vsel %vm76_vm0, %v1322_v22, %v1324_v9  ;;  %2023 = vmatmul.bf16.vlgmr.msrb.gmra.mxu3 %v4214_v21  ;;  %v1327_v32 = vsel %vm76_vm0, %v1323_v11, %v1326_v18  ;;  %v1287_v8 = vadd.f32 %v1277_v23, %v1265_v12  ;;  %v3300_v44 = vld [vmem:[#allocation5 + $0x258] sm:$0xf0]  ;;  %v3630_v45 = vld [vmem:[#allocation5 + $0x2d4] sm:$0xf]  ;;  %v3164_v38 = vld [vmem:[#allocation5 + $0x148] sm:$0xf0] }
 0x257   :  { %v4219_v36 = vpack.c.bf16 %v1325_v26, %v1322_v22  ;;  %v4222_v39 = vpack.c.bf16 %v1327_v32, %v1323_v11  ;;  %v1289_v40 = vadd.f32 %v1277_v23, %v1267_v15  ;;  %v4231_v41 = vsel %vm1294_vm15, %v1286_v13, %v1302_v29  ;;  %v3602_v23 = vld [vmem:[#allocation5 + $0x1f4] sm:$0xf]  ;;  %v3252_v22 = vld [vmem:[#allocation5 + $0x1f8] sm:$0xf0]  ;;  %v3632_v26 = vld [vmem:[#allocation5 + $0x2e4] sm:$0xf] }
 0x258   :  { %vm1295_vm2 = vcmp.gt.f32.partialorder %v1287_v8, 0.0  ;;  %v1303_v46 = vmul.f32 0.01, %v1287_v8  ;;  %v4234_v0 = vsel %vm1296_vm1, %v1288_v3, %v1304_v7  ;;  %v3015_v31 = vor.u32 %v3542_v30, %v3012_v34  ;;  %v3372_v30 = vld [vmem:[#allocation5 + $0x2e8] sm:$0xf0] }
 0x259   :  { %3387 = vmatmul.msk.bf16.vlgmr.msrb.gmra.mxu0 %vm3859_vm3, %v4219_v36  ;;  %3395 = vmatmul.msk.bf16.vlgmr.msrb.gmra.mxu1 %vm3859_vm3, %v4222_v39  ;;  %vm1297_vm7 = vcmp.gt.f32.partialorder %v1289_v40, 0.0  ;;  %v1305_v14 = vmul.f32 0.01, %v1289_v40  ;;  %v3267_v52 = vor.u32 %v3607_v17, %v3266_v37  ;;  %v1330_v54 = vrot.slane %v4234_v0, 7  ;;  %v3584_v34 = vld [vmem:[#allocation5 + $0x164] sm:$0xf] }
 0x25a   :  { %v4236_v61 = vsel %vm1295_vm2, %v1287_v8, %v1303_v46  ;;  %v1328_v60 = vrot.slane %v4231_v41, 7  ;;  %2078 = vmatpush.bf16.msra.mxu2 %v3015_v31  ;;  %v3007_v19 = vor.u32 %v3540_v47, %v3004_v48  ;;  %v3071_v13 = vor.u32 %v3556_v51, %v3068_v55  ;;  %v3600_v32 = vld [vmem:[#allocation5 + $0x1e4] sm:$0xf]  ;;  %v3244_v7 = vld [vmem:[#allocation5 + $0x1e8] sm:$0xf0] }
 0x25b   :  { %v4238_v50 = vsel %vm1297_vm7, %v1289_v40, %v1305_v14  ;;  %v1329_v59 = vrot.slane %v4236_v61, 7  ;;  %2040 = vmatpush.bf16.msra.mxu0 %v3267_v52  ;;  %v3259_v3 = vor.u32 %v3605_v58, %v3258_v49  ;;  %v3323_v11 = vor.u32 %v3621_v43, %v3322_v42  ;;  %v3614_v17 = vld [vmem:[#allocation5 + $0x254] sm:$0xf]  ;;  %v3364_v51 = vld [vmem:[#allocation5 + $0x2d8] sm:$0xf0] }
 0x25c   :  { %v1332_v9 = vrot.slane %v4238_v50, 7  ;;  %v3319_v12 = vor.u32 %v3618_v57, %v3316_v53  ;;  %v3383_v15 = vor.u32 %v3634_v1, %v3380_v4  ;;  %v3191_v18 = vor.u32 %v3586_v62, %v3188_v2  ;;  %2098 = vmatpush.bf16.msra.mxu3 %v3071_v13  ;;  %v3582_v55 = vld [vmem:[#allocation5 + $0x154] sm:$0xf]  ;;  %v3172_v49 = vld [vmem:[#allocation5 + $0x158] sm:$0xf0] }
 0x25d   :  { %v3255_v29 = vor.u32 %v3602_v23, %v3252_v22  ;;  %v4246_v8 = vpack.c.bf16 %v4234_v0, %v4231_v41  ;;  %2060 = vmatpush.bf16.msra.mxu1 %v3323_v11  ;;  %v3311_v35 = vor.u32 %v3616_v24, %v3308_v25  ;;  %v1331_v37 = vsel %vm76_vm0, %v1328_v60, %v1330_v54  ;;  %v3598_v14 = vld [vmem:[#allocation5 + $0x1d4] sm:$0xf]  ;;  %v3236_v58 = vld [vmem:[#allocation5 + $0x1d8] sm:$0xf0]  ;;  %v3612_v52 = vld [vmem:[#allocation5 + $0x244] sm:$0xf] }
 0x25e   :  { %2079 = vmatpush.bf16.msra.mxu2 %v3007_v19  ;;  %v3375_v40 = vor.u32 %v3632_v26, %v3372_v30  ;;  %v3183_v16 = vor.u32 %v3584_v34, %v3180_v33  ;;  %v4251_v46 = vpack.c.bf16 %v4238_v50, %v4236_v61  ;;  %v1333_v47 = vsel %vm76_vm0, %v1329_v59, %v1332_v9  ;;  %v3292_v53 = vld [vmem:[#allocation5 + $0x248] sm:$0xf0]  ;;  %v3628_v1 = vld [vmem:[#allocation5 + $0x2c4] sm:$0xf]  ;;  %v3284_v23 = vld [vmem:[#allocation5 + $0x238] sm:$0xf0] }
 0x25f   :  { %2041 = vmatpush.bf16.msra.mxu0 %v3259_v3  ;;  %v3247_v48 = vor.u32 %v3600_v32, %v3244_v7  ;;  %v4256_v31 = vpack.c.bf16 %v1331_v37, %v1328_v60  ;;  %v3303_v28 = vor.u32 %v3614_v17, %v3300_v44  ;;  %v4258_v42 = vpack.c.bf16 %v1333_v47, %v1329_v59  ;;  %v3356_v54 = vld [vmem:[#allocation5 + $0x2c8] sm:$0xf0]  ;;  %v3580_v60 = vld [vmem:[#allocation5 + $0x144] sm:$0xf]  ;;  %v3610_v3 = vld [vmem:[#allocation5 + $0x234] sm:$0xf] }
 0x260   :  { %2167 = vmatpush.bf16.msrb.mxu3 %v3383_v15  ;;  %v3367_v43 = vor.u32 %v3630_v45, %v3364_v51  ;;  %v3175_v57 = vor.u32 %v3582_v55, %v3172_v49  ;;  %v3239_v4 = vor.u32 %v3598_v14, %v3236_v58  ;;  %v3596_v62 = vld [vmem:[#allocation5 + $0x1c4] sm:$0xf]  ;;  %v3228_v2 = vld [vmem:[#allocation5 + $0x1c8] sm:$0xf0]  ;;  %v3295_v59 = vor.u32 %v3612_v52, %v3292_v53  ;;  %v3626_v22 = vld [vmem:[#allocation5 + $0x2b4] sm:$0xf] }
 0x261   :  { %2129 = vmatpush.bf16.msrb.mxu1 %v3255_v29  ;;  %v3359_v19 = vor.u32 %v3628_v1, %v3356_v54  ;;  %v3167_v13 = vor.u32 %v3580_v60, %v3164_v38  ;;  %v3231_v9 = vor.u32 %v3596_v62, %v3228_v2  ;;  %v3348_v11 = vld [vmem:[#allocation5 + $0x2b8] sm:$0xf0]  ;;  %v3594_v24 = vld [vmem:[#allocation5 + $0x1b4] sm:$0xf]  ;;  %v1347_v26 = vrot.slane %v4196_v5, 1 }
 0x262   :  { %2148 = vmatpush.bf16.msrb.mxu2 %v3319_v12  ;;  %v3578_v12 = vld [vmem:[#allocation5 + $0x134] sm:$0xf]  ;;  %v3156_v15 = vld [vmem:[#allocation5 + $0x138] sm:$0xf0]  ;;  %v1349_v29 = vrot.slane %v4194_v20, 1  ;;  %v1350_v30 = vrot.slane %v4199_v6, 1  ;;  %v3287_v34 = vor.u32 %v3610_v3, %v3284_v23  ;;  %v3351_v33 = vor.u32 %v3626_v22, %v3348_v11 }
 0x263   :  { %2110 = vmatpush.bf16.msrb.mxu0 %v3191_v18  ;;  %v1346_v18 = vrot.slane %v4192_v63, 1  ;;  %v3220_v25 = vld [vmem:[#allocation5 + $0x1b8] sm:$0xf0]  ;;  %v3159_v32 = vor.u32 %v3578_v12, %v3156_v15  ;;  %v3608_v7 = vld [vmem:[#allocation5 + $0x224] sm:$0xf]  ;;  %v1352_v12 = vrot.slane %v4231_v41, 1 }
 0x264   :  { %2168 = vmatpush.bf16.msrb.mxu3 %v3375_v40  ;;  %v3624_v37 = vld [vmem:[#allocation5 + $0x2a4] sm:$0xf]  ;;  %v3223_v40 = vor.u32 %v3594_v24, %v3220_v25  ;;  %v3340_v63 = vld [vmem:[#allocation5 + $0x2a8] sm:$0xf0]  ;;  %v3268_v51 = vld [vmem:[#allocation5 + $0x218] sm:$0xf0]  ;;  %v1351_v49 = vsel %vm101_vm4, %v1349_v29, %v1350_v30 }
 0x265   :  { %2130 = vmatpush.bf16.msrb.mxu1 %v3247_v48  ;;  %v3148_v17 = vld [vmem:[#allocation5 + $0x128] sm:$0xf0]  ;;  %v3592_v44 = vld [vmem:[#allocation5 + $0x1a4] sm:$0xf]  ;;  %v1348_v6 = vsel %vm101_vm4, %v1346_v18, %v1347_v26  ;;  %v3343_v45 = vor.u32 %v3624_v37, %v3340_v63  ;;  %v3606_v48 = vld [vmem:[#allocation5 + $0x214] sm:$0xf] }
 0x266   :  { %2009 = vmatmul.bf16.gmra.mxu2 %v4246_v8  ;;  %2028 = vmatmul.bf16.gmra.mxu3 %v4251_v46  ;;  %v3212_v5 = vld [vmem:[#allocation5 + $0x1a8] sm:$0xf0]  ;;  %v3622_v55 = vld [vmem:[#allocation5 + $0x294] sm:$0xf]  ;;  %v3332_v58 = vld [vmem:[#allocation5 + $0x298] sm:$0xf0]  ;;  %v4278_v53 = vpack.c.bf16 %v1347_v26, %v1348_v6  ;;  %v3271_v1 = vor.u32 %v3606_v48, %v3268_v51 }
 0x267   :  { %2149 = vmatpush.bf16.msrb.mxu2 %v3311_v35  ;;  %2111 = vmatpush.bf16.msrb.mxu0 %v3183_v16  ;;  %v3276_v35 = vld [vmem:[#allocation5 + $0x228] sm:$0xf0]  ;;  %v3576_v16 = vld [vmem:[#allocation5 + $0x124] sm:$0xf]  ;;  %v3215_v14 = vor.u32 %v3592_v44, %v3212_v5  ;;  %v3204_v52 = vld [vmem:[#allocation5 + $0x198] sm:$0xf0]  ;;  %v3335_v54 = vor.u32 %v3622_v55, %v3332_v58 }
 0x268   :  { %2169 = vmatpush.bf16.msrb.mxu3 %v3367_v43  ;;  %v3279_v20 = vor.u32 %v3608_v7, %v3276_v35  ;;  %v3151_v47 = vor.u32 %v3576_v16, %v3148_v17  ;;  %v3140_v43 = vld [vmem:[#allocation5 + $0x118] sm:$0xf0]  ;;  %v3604_v38 = vld [vmem:[#allocation5 + $0x204] sm:$0xf]  ;;  %v3260_v62 = vld [vmem:[#allocation5 + $0x208] sm:$0xf0] }
 0x269   :  { %3391 = vmatmul.msk.bf16.gmra.mxu0 %vm3859_vm3, %v4256_v31  ;;  %3399 = vmatmul.msk.bf16.gmra.mxu1 %vm3859_vm3, %v4258_v42  ;;  %v3620_v2 = vld [vmem:[#allocation5 + $0x284] sm:$0xf]  ;;  %v3196_v3 = vld [vmem:[#allocation5 + $0x188] sm:$0xf0]  ;;  %v3263_v23 = vor.u32 %v3604_v38, %v3260_v62  ;;  %v1353_v15 = vrot.slane %v4234_v0, 1  ;;  %v1355_v18 = vrot.slane %v4236_v61, 1 }
 0x26a   :  { %2131 = vmatpush.bf16.msrb.mxu1 %v3239_v4  ;;  %v4280_v4 = vpack.c.bf16 %v1350_v30, %v1351_v49  ;;  %v1356_v24 = vrot.slane %v4238_v50, 1  ;;  %v3652_v25 = vld [vmem:[%s4536_s4 + $0x78] sm:$0xff]  ;;  %v3654_v41 = vld [vmem:[%s4536_s4 + $0x70] sm:$0xff]  ;;  %v3656_v29 = vld [vmem:[%s4536_s4 + $0x68] sm:$0xff] }
 0x26b   :  { %2150 = vmatpush.bf16.msrb.mxu2 %v3303_v28  ;;  %2112 = vmatpush.bf16.msrb.mxu0 %v3175_v57  ;;  %v3574_v28 = vld [vmem:[#allocation5 + $0x114] sm:$0xf]  ;;  %v3653_v26 = vld [vmem:[%s4536_s4 + $0xf8] sm:$0xff]  ;;  %v1354_v0 = vsel %vm101_vm4, %v1352_v12, %v1353_v15  ;;  %v3657_v30 = vld [vmem:[%s4536_s4 + $0xe8] sm:$0xff] }
 0x26c   :  { %2170 = vmatpush.bf16.msrb.mxu3 %v3359_v19  ;;  %v3590_v57 = vld [vmem:[#allocation5 + $0x194] sm:$0xf]  ;;  %v3143_v60 = vor.u32 %v3574_v28, %v3140_v43  ;;  %v3132_v19 = vld [vmem:[#allocation5 + $0x108] sm:$0xf0]  ;;  %v1357_v50 = vsel %vm101_vm4, %v1355_v18, %v1356_v24  ;;  %v3662_v7 = vld [vmem:[%s4536_s4 + $0xd8] sm:$0xff] }
 0x26d   :  { %v3655_v61 = vld [vmem:[%s4536_s4 + $0xf0] sm:$0xff]  ;;  %v3663_v35 = vld [vmem:[%s4536_s4 + $0x48] sm:$0xff]  ;;  %v3667_v16 = vld [vmem:[%s4536_s4 + $0x38] sm:$0xff] }
 0x26e   :  { %2132 = vmatpush.bf16.msrb.mxu1 %v3231_v9  ;;  %v3664_v37 = vld [vmem:[%s4536_s4 + $0xd0] sm:$0xff]  ;;  %v3666_v63 = vld [vmem:[%s4536_s4 + $0xc8] sm:$0xff]  ;;  %v3668_v17 = vld [vmem:[%s4536_s4 + $0xc0] sm:$0xff] }
 0x26f   :  { %2151 = vmatpush.bf16.msrb.mxu2 %v3295_v59  ;;  %2113 = vmatpush.bf16.msrb.mxu0 %v3167_v13  ;;  %v3572_v59 = vld [vmem:[#allocation5 + $0x104] sm:$0xf]  ;;  %v3669_v44 = vld [vmem:[%s4536_s4 + $0x30] sm:$0xff]  ;;  %v3670_v5 = vld [vmem:[%s4536_s4 + $0xb8] sm:$0xff] }
 0x270   :  { %2171 = vmatpush.bf16.msrb.mxu3 %v3351_v33  ;;  %v3588_v13 = vld [vmem:[#allocation5 + $0x184] sm:$0xf]  ;;  %v3135_v9 = vor.u32 %v3572_v59, %v3132_v19  ;;  %v3675_v48 = vld [vmem:[%s4536_s4 + $0x10] sm:$0xff]  ;;  %v3676_v51 = vld [vmem:[%s4536_s4 + $0xa8] sm:$0xff] }
 0x271   :  { %v3199_v11 = vor.u32 %v3588_v13, %v3196_v3  ;;  %v3658_v33 = vld [vmem:[%s4536_s4 + $0x60] sm:$0xff]  ;;  %v3680_v49 = vld [vmem:[%s4536_s4 + $0x98] sm:$0xff]  ;;  %v3682_v58 = vld [vmem:[%s4537_s5 + $0x10] sm:$0xff] }
 0x272   :  { %2133 = vmatpush.bf16.msrb.mxu1 %v3223_v40  ;;  %v3665_v40 = vld [vmem:[%s4536_s4 + $0x40] sm:$0xff]  ;;  %v3683_v28 = vld [vmem:[%s4536_s4 + $0x88] sm:$0xff] }
 0x273   :  { %2152 = vmatpush.bf16.msrb.mxu2 %v3287_v34  ;;  %2114 = vmatpush.bf16.msrb.mxu0 %v3159_v32  ;;  %v4318_v34 = vpack.c.bf16 %v1353_v15, %v1354_v0  ;;  %v4323_v32 = vpack.c.bf16 %v1356_v24, %v1357_v50  ;;  %v3672_v6 = vld [vmem:[%s4536_s4 + $0x20] sm:$0xff] }
 0x274   :  { %2172 = vmatpush.bf16.msrb.mxu3 %v3343_v45  ;;  %v3673_v45 = vld [vmem:[%s4536_s4 + $0xb0] sm:$0xff]  ;;  %v3679_v55 = vld [vmem:[%s4536_s4] sm:$0xff] }
 0x275   :  { %v3684_v43 = vld [vmem:[%s4537_s5] sm:$0xff] }
 0x276   :  { %3415 = vmatmul.msk.bf16.vlgmr.msra.gmra.mxu2 %vm3859_vm3, %v4219_v36  ;;  %3423 = vmatmul.msk.bf16.vlgmr.msra.gmra.mxu3 %vm3859_vm3, %v4222_v39  ;;  %v3207_v36 = vor.u32 %v3590_v57, %v3204_v52  ;;  %v3324_v39 = vld [vmem:[#allocation5 + $0x288] sm:$0xf0]  ;;  %v3685_v57 = vld [vmem:[%s4536_s4 + $0x80] sm:$0xff]  ;;  %v3686_v52 = vld [vmem:[%s4537_s5 + $0x18] sm:$0xff] }
 0x277   :  { %2153 = vmatpush.bf16.msrb.mxu2 %v3279_v20  ;;  %2115 = vmatpush.bf16.msrb.mxu0 %v3151_v47  ;;  %v3327_v22 = vor.u32 %v3620_v2, %v3324_v39  ;;  %v3671_v20 = vld [vmem:[%s4536_s4 + $0x28] sm:$0xff]  ;;  %v3674_v47 = vld [vmem:[%s4536_s4 + $0x18] sm:$0xff] }
 0x278   :  { %2134 = vmatpush.bf16.msrb.mxu1 %v3215_v14  ;;  %2173 = vmatpush.bf16.msrb.mxu3 %v3335_v54  ;;  %v3681_v14 = vld [vmem:[%s4536_s4 + $0x90] sm:$0xff] }
 0x279   :  { %3402 = vmatmul.msk.bf16.vlgmr.msra.gmra.mxu0 %vm3939_vm5, %v4278_v53  ;;  %3408 = vmatmul.msk.bf16.vlgmr.msra.gmra.mxu1 %vm3939_vm5, %v4280_v4 }
 0x27b   :  { %2154 = vmatpush.bf16.msrb.mxu2 %v3271_v1  ;;  %2116 = vmatpush.bf16.msrb.mxu0 %v3143_v60 }
 0x27c   :  { %2135 = vmatpush.bf16.msrb.mxu1 %v3207_v36  ;;  %2174 = vmatpush.bf16.msrb.mxu3 %v3327_v22 }
 0x27f   :  { %2155 = vmatpush.bf16.msrb.mxu2 %v3263_v23  ;;  %2117 = vmatpush.bf16.msrb.mxu0 %v3135_v9 }
 0x280   :  { %2136 = vmatpush.bf16.msrb.mxu1 %v3199_v11  ;;  %2327 = vmatpush.msra.mxu3 %v3653_v26 }
 0x282   :  { %2328 = vmatpush.msra.mxu3 %v3655_v61 }
 0x283   :  { %2258 = vmatpush.msra.mxu0 %v3652_v25  ;;  %2307 = vmatpush.msra.mxu2 %v3652_v25 }
 0x284   :  { %2278 = vmatpush.msra.mxu1 %v3653_v26  ;;  %2329 = vmatpush.msra.mxu3 %v3657_v30 }
 0x285   :  { %2259 = vmatpush.msra.mxu0 %v3654_v41  ;;  %2308 = vmatpush.msra.mxu2 %v3654_v41 }
 0x286   :  { %2279 = vmatpush.msra.mxu1 %v3655_v61  ;;  %3419 = vmatmul.msk.bf16.gmra.mxu2 %vm3859_vm3, %v4256_v31  ;;  %v3660_v31 = vld [vmem:[%s4536_s4 + $0x58] sm:$0xff] }
 0x287   :  { %2260 = vmatpush.msra.mxu0 %v3656_v29  ;;  %3427 = vmatmul.msk.bf16.gmra.mxu3 %vm3859_vm3, %v4258_v42  ;;  %v3661_v42 = vld [vmem:[%s4536_s4 + $0x50] sm:$0xff] }
 0x288   :  { %2280 = vmatpush.msra.mxu1 %v3657_v30  ;;  %2309 = vmatpush.msra.mxu2 %v3656_v29 }
 0x289   :  { %2261 = vmatpush.msra.mxu0 %v3658_v33  ;;  %3411 = vmatmul.msk.bf16.gmra.mxu1 %vm3939_vm5, %v4323_v32 }
 0x28a   :  { %3405 = vmatmul.msk.bf16.gmra.mxu0 %vm3939_vm5, %v4318_v34  ;;  %2281 = vmatpush.msra.mxu1 %v3659_v56 }
 0x28b   :  { %2262 = vmatpush.msra.mxu0 %v3660_v31  ;;  %2310 = vmatpush.msra.mxu2 %v3658_v33 }
 0x28c   :  { %2330 = vmatpush.msra.mxu3 %v3659_v56  ;;  %2282 = vmatpush.msra.mxu1 %v3662_v7 }
 0x28d   :  { %2263 = vmatpush.msra.mxu0 %v3661_v42  ;;  %2311 = vmatpush.msra.mxu2 %v3660_v31 }
 0x28e   :  { %2331 = vmatpush.msra.mxu3 %v3662_v7  ;;  %2283 = vmatpush.msra.mxu1 %v3664_v37 }
 0x28f   :  { %2264 = vmatpush.msra.mxu0 %v3663_v35  ;;  %2312 = vmatpush.msra.mxu2 %v3661_v42 }
 0x290   :  { %2332 = vmatpush.msra.mxu3 %v3664_v37  ;;  %2284 = vmatpush.msra.mxu1 %v3666_v63 }
 0x291   :  { %2265 = vmatpush.msra.mxu0 %v3665_v40  ;;  %2313 = vmatpush.msra.mxu2 %v3663_v35 }
 0x292   :  { %2333 = vmatpush.msra.mxu3 %v3666_v63  ;;  %2285 = vmatpush.msra.mxu1 %v3668_v17 }
 0x293   :  { %2266 = vmatpush.msra.mxu0 %v3667_v16  ;;  %2314 = vmatpush.msra.mxu2 %v3665_v40 }
 0x294   :  { %2334 = vmatpush.msra.mxu3 %v3668_v17  ;;  %2286 = vmatpush.msra.mxu1 %v3670_v5 }
 0x295   :  { %2267 = vmatpush.msra.mxu0 %v3669_v44  ;;  %2315 = vmatpush.msra.mxu2 %v3667_v16 }
 0x296   :  { %2335 = vmatpush.msra.mxu3 %v3670_v5  ;;  %3430 = vmatmul.msk.bf16.vlgmr.msrb.gmra.mxu2 %vm3939_vm5, %v4278_v53  ;;  %v3687_v53 = vld [vmem:[%s4537_s5 + $0x8] sm:$0xff] }
 0x297   :  { %2268 = vmatpush.msra.mxu0 %v3671_v20  ;;  %3436 = vmatmul.msk.bf16.vlgmr.msrb.gmra.mxu3 %vm3939_vm5, %v4280_v4 }
 0x298   :  { %2316 = vmatpush.msra.mxu2 %v3669_v44  ;;  %2287 = vmatpush.msra.mxu1 %v3673_v45 }
 0x299   :  { %2269 = vmatpush.msra.mxu0 %v3672_v6  ;;  %2137 = vmatmul.bf16.vlgmr.msrb.gmra.mxu1 %v4214_v21  ;;  %v3678_v21 = vld [vmem:[%s4536_s4 + $0xa0] sm:$0xff] }
 0x29a   :  { %2118 = vmatmul.bf16.vlgmr.msrb.gmra.mxu0 %v4204_v10  ;;  %2317 = vmatpush.msra.mxu2 %v3671_v20  ;;  %v3677_v10 = vld [vmem:[%s4536_s4 + $0x8] sm:$0xff] }
 0x29b   :  { %2270 = vmatpush.msra.mxu0 %v3674_v47  ;;  %2336 = vmatpush.msra.mxu3 %v3673_v45 }
 0x29c   :  { %2318 = vmatpush.msra.mxu2 %v3672_v6  ;;  %2288 = vmatpush.msra.mxu1 %v3676_v51 }
 0x29d   :  { %2271 = vmatpush.msra.mxu0 %v3675_v48  ;;  %2337 = vmatpush.msra.mxu3 %v3676_v51 }
 0x29e   :  { %2319 = vmatpush.msra.mxu2 %v3674_v47  ;;  %2289 = vmatpush.msra.mxu1 %v3678_v21 }
 0x29f   :  { %2272 = vmatpush.msra.mxu0 %v3677_v10  ;;  %2338 = vmatpush.msra.mxu3 %v3678_v21 }
 0x2a0   :  { %2320 = vmatpush.msra.mxu2 %v3675_v48  ;;  %2290 = vmatpush.msra.mxu1 %v3680_v49 }
 0x2a1   :  { %2273 = vmatpush.msra.mxu0 %v3679_v55  ;;  %2339 = vmatpush.msra.mxu3 %v3680_v49 }
 0x2a2   :  { %2321 = vmatpush.msra.mxu2 %v3677_v10  ;;  %2291 = vmatpush.msra.mxu1 %v3681_v14 }
 0x2a3   :  { %2383 = vmatpush.msrb.mxu0 %v3682_v58  ;;  %2340 = vmatpush.msra.mxu3 %v3681_v14 }
 0x2a4   :  { %2322 = vmatpush.msra.mxu2 %v3679_v55  ;;  %2292 = vmatpush.msra.mxu1 %v3683_v28 }
 0x2a5   :  { %2341 = vmatpush.msra.mxu3 %v3683_v28  ;;  %2384 = vmatpush.msrb.mxu0 %v3684_v43 }
 0x2a6   :  { %2426 = vmatpush.msrb.mxu2 %v3682_v58  ;;  %2293 = vmatpush.msra.mxu1 %v3685_v57 }
 0x2a7   :  { %3433 = vmatmul.msk.bf16.gmra.mxu2 %vm3939_vm5, %v4318_v34  ;;  %3439 = vmatmul.msk.bf16.gmra.mxu3 %vm3939_vm5, %v4323_v32 }
 0x2a8   :  { %2403 = vmatpush.msrb.mxu1 %v3686_v52  ;;  %2342 = vmatpush.msra.mxu3 %v3685_v57 }
 0x2a9   :  { %2427 = vmatpush.msrb.mxu2 %v3684_v43  ;;  %2142 = vmatmul.bf16.gmra.mxu1 %v4251_v46 }
 0x2aa   :  { %2123 = vmatmul.bf16.gmra.mxu0 %v4246_v8  ;;  %2446 = vmatpush.msrb.mxu3 %v3686_v52 }
 0x2ab   :  { %2404 = vmatpush.msrb.mxu1 %v3687_v53 }
 0x2ac   :  { %2447 = vmatpush.msrb.mxu3 %v3687_v53 }
 0x2d6   :  { %v1967_v27 = vpop.f32.mrf.mxu0  ;;  %v1986_v1 = vpop.f32.mrf.mxu1 }
 0x2d7   :  { %v1987_v23 = vadd.f32 %v1986_v1, %v1967_v27 }
 0x2d9   :  { %v2005_v4 = vpop.f32.mrf.mxu2  ;;  %v2024_v54 = vpop.f32.mrf.mxu3 }
 0x2da   :  { %v2006_v12 = vadd.f32 %v2005_v4, %v1987_v23 }
 0x2dc   :  { %v2025_v25 = vadd.f32 %v2024_v54, %v2006_v12 }
 0x2de   :  { %v1969_v60 = vpop.f32.mrf.mxu0  ;;  %v1988_v38 = vpop.f32.mrf.mxu1 }
 0x2df   :  { %v1989_v22 = vadd.f32 %v1988_v38, %v1969_v60 }
 0x2e1   :  { %v2007_v62 = vpop.f32.mrf.mxu2  ;;  %v2026_v2 = vpop.f32.mrf.mxu3 }
 0x2e2   :  { %v2008_v15 = vadd.f32 %v2007_v62, %v1989_v22 }
 0x2e4   :  { %v2027_v26 = vadd.f32 %v2026_v2, %v2008_v15 }
 0x2e6   :  { %v1972_v36 = vpop.f32.mrf.mxu0  ;;  %v1991_v39 = vpop.f32.mrf.mxu1 }
 0x2e7   :  { %v1992_v29 = vadd.f32 %v1991_v39, %v1972_v36 }
 0x2e9   :  { %v2010_v8 = vpop.f32.mrf.mxu2  ;;  %v2029_v59 = vpop.f32.mrf.mxu3 }
 0x2ea   :  { %v2011_v56 = vadd.f32 %v2010_v8, %v1992_v29 }
 0x2ec   :  { %v2030_v63 = vadd.f32 %v2029_v59, %v2011_v56 }
 0x2ee   :  { %v1974_v19 = vpop.f32.mrf.mxu0  ;;  %v1993_v46 = vpop.f32.mrf.mxu1 }
 0x2ef   :  { %v1994_v31 = vadd.f32 %v1993_v46, %v1974_v19 }
 0x2f1   :  { %v2012_v13 = vpop.f32.mrf.mxu2  ;;  %v2031_v3 = vpop.f32.mrf.mxu3 }
 0x2f2   :  { %v2013_v16 = vadd.f32 %v2012_v13, %v1994_v31 }
 0x2f4   :  { %v2032_v45 = vadd.f32 %v2031_v3, %v2013_v16 }
 0x2f6   :  { %v2043_v9 = vpop.f32.mrf.mxu0  ;;  %v2062_v11 = vpop.f32.mrf.mxu1 }
 0x2f7   :  { %v2044_v0 = vadd.f32 %v2043_v9, %v2025_v25 }
 0x2f9   :  { %v2081_v18 = vpop.f32.mrf.mxu2  ;;  %v2100_v24 = vpop.f32.mrf.mxu3  ;;  %v4436_v32 = vadd.f32 %v2062_v11, %v2044_v0 }
 0x2fa   :  { %v2101_v36 = vadd.f32 %v2100_v24, %v2081_v18 }
 0x2fb   :  { %v2214_v37 = vmul.f32 %v4436_v32, %v4436_v32 }
 0x2fe   :  { %v2045_v41 = vpop.f32.mrf.mxu0  ;;  %v2064_v50 = vpop.f32.mrf.mxu1 }
 0x2ff   :  { %v2046_v61 = vadd.f32 %v2045_v41, %v2027_v26 }
 0x301   :  { %v4434_v30 = vadd.f32 %v2064_v50, %v2046_v61  ;;  %v2083_v34 = vpop.f32.mrf.mxu2  ;;  %v2102_v33 = vpop.f32.mrf.mxu3 }
 0x302   :  { %v2103_v9 = vadd.f32 %v2102_v33, %v2083_v34 }
 0x303   :  { %v2216_v42 = vmul.f32 %v4434_v30, %v4434_v30  ;;  %v2186_v7 = vadd.f32 %v4434_v30, %v4436_v32 }
 0x305   :  { %v2222_v17 = vadd.f32 %v2216_v42, %v2214_v37  ;;  %v2187_v5 = vrot.slane %v2186_v7, 4 }
 0x306   :  { %v2067_v40 = vpop.f32.mrf.mxu1 }
 0x307   :  { %v2048_v35 = vpop.f32.mrf.mxu0  ;;  %v2223_v47 = vrot.slane %v2222_v17, 4  ;;  %v2188_v48 = vadd.f32 %v2187_v5, %v2186_v7 }
 0x308   :  { %v2049_v6 = vadd.f32 %v2048_v35, %v2030_v63 }
 0x309   :  { %v2086_v44 = vpop.f32.mrf.mxu2  ;;  %v2224_v49 = vadd.f32 %v2223_v47, %v2222_v17  ;;  %v2189_v28 = vrot.slane %v2188_v48, 2 }
 0x30a   :  { %v2105_v20 = vpop.f32.mrf.mxu3  ;;  %v4444_v10 = vadd.f32 %v2067_v40, %v2049_v6 }
 0x30b   :  { %v2225_v27 = vrot.slane %v2224_v49, 2  ;;  %v2190_v54 = vadd.f32 %v2189_v28, %v2188_v48  ;;  %v2106_v37 = vadd.f32 %v2105_v20, %v2086_v44 }
 0x30c   :  { %v2218_v57 = vmul.f32 %v4444_v10, %v4444_v10 }
 0x30d   :  { %v2226_v39 = vadd.f32 %v2225_v27, %v2224_v49  ;;  %v2191_v46 = vrot.slane %v2190_v54, 1 }
 0x30e   :  { %v2069_v55 = vpop.f32.mrf.mxu1 }
 0x30f   :  { %v2050_v51 = vpop.f32.mrf.mxu0  ;;  %v2227_v15 = vrot.slane %v2226_v39, 1  ;;  %v2192_v26 = vadd.f32 %v2191_v46, %v2190_v54 }
 0x310   :  { %v2051_v21 = vadd.f32 %v2050_v51, %v2032_v45 }
 0x311   :  { %v2088_v58 = vpop.f32.mrf.mxu2  ;;  %v2228_v31 = vadd.f32 %v2227_v15, %v2226_v39 }
 0x312   :  { %v4446_v14 = vadd.f32 %v2069_v55, %v2051_v21  ;;  %v2107_v43 = vpop.f32.mrf.mxu3 }
 0x313   :  { %v2108_v44 = vadd.f32 %v2107_v43, %v2088_v58 }
 0x314   :  { %v2200_v52 = vadd.f32 %v4446_v14, %v4444_v10  ;;  %v2220_v53 = vmul.f32 %v4446_v14, %v4446_v14 }
 0x316   :  { %v2201_v1 = vrot.slane %v2200_v52, 4  ;;  %v2236_v4 = vadd.f32 %v2220_v53, %v2218_v57  ;;  %v2138_v2 = vpop.f32.mrf.mxu1 }
 0x317   :  { %v2119_v60 = vpop.f32.mrf.mxu0 }
 0x318   :  { %v2202_v38 = vadd.f32 %v2201_v1, %v2200_v52  ;;  %v2237_v62 = vrot.slane %v2236_v4, 4  ;;  %v2120_v22 = vadd.f32 %v2119_v60, %v2101_v36 }
 0x319   :  { %v2157_v19 = vpop.f32.mrf.mxu2 }
 0x31a   :  { %v2203_v8 = vrot.slane %v2202_v38, 2  ;;  %v2238_v59 = vadd.f32 %v2237_v62, %v2236_v4  ;;  %v2176_v13 = vpop.f32.mrf.mxu3  ;;  %v2139_v41 = vadd.f32 %v2138_v2, %v2120_v22 }
 0x31c   :  { %v2204_v3 = vadd.f32 %v2203_v8, %v2202_v38  ;;  %v2239_v23 = vrot.slane %v2238_v59, 2  ;;  %v2158_v35 = vadd.f32 %v2157_v19, %v2139_v41 }
 0x31e   :  { %v2205_v11 = vrot.slane %v2204_v3, 1  ;;  %v2240_v12 = vadd.f32 %v2239_v23, %v2238_v59  ;;  %v2140_v61 = vpop.f32.mrf.mxu1  ;;  %v4458_v16 = vadd.f32 %v2176_v13, %v2158_v35 }
 0x31f   :  { %v2121_v25 = vpop.f32.mrf.mxu0 }
 0x320   :  { %v2122_v0 = vadd.f32 %v2121_v25, %v2103_v9  ;;  %v2206_v50 = vadd.f32 %v2205_v11, %v2204_v3  ;;  %v2241_v18 = vrot.slane %v2240_v12, 1  ;;  %v2215_v48 = vmul.f32 %v4458_v16, %v4458_v16 }
 0x321   :  { %v2159_v29 = vpop.f32.mrf.mxu2 }
 0x322   :  { %v2141_v24 = vadd.f32 %v2140_v61, %v2122_v0  ;;  %v2254_v56 = vsel %vm1042_vm6, %v2206_v50, %v2192_v26  ;;  %v2242_v42 = vadd.f32 %v2241_v18, %v2240_v12  ;;  %v2178_v7 = vpop.f32.mrf.mxu3 }
 0x323   :  { %2274 = vmatmul.f32.vlgmr.msra.gmra.mxu0 %v2254_v56 }
 0x324   :  { %v2160_v34 = vadd.f32 %v2159_v29, %v2141_v24  ;;  %v2303_v33 = vsel %vm1042_vm6, %v2242_v42, %v2228_v31 }
 0x325   :  { %2323 = vmatmul.f32.vlgmr.msra.gmra.mxu2 %v2303_v33 }
 0x326   :  { %v4456_v40 = vadd.f32 %v2178_v7, %v2160_v34  ;;  %v2143_v5 = vpop.f32.mrf.mxu1 }
 0x327   :  { %v2124_v63 = vpop.f32.mrf.mxu0 }
 0x328   :  { %v2125_v17 = vadd.f32 %v2124_v63, %v2106_v37  ;;  %v2217_v6 = vmul.f32 %v4456_v40, %v4456_v40  ;;  %v2193_v51 = vadd.f32 %v4456_v40, %v4458_v16 }
 0x32a   :  { %v2162_v45 = vpop.f32.mrf.mxu2  ;;  %v2181_v47 = vpop.f32.mrf.mxu3  ;;  %v2144_v21 = vadd.f32 %v2143_v5, %v2125_v17  ;;  %v2229_v20 = vadd.f32 %v2217_v6, %v2215_v48  ;;  %v2194_v49 = vrot.slane %v2193_v51, 4 }
 0x32c   :  { %v2163_v28 = vadd.f32 %v2162_v45, %v2144_v21  ;;  %v2230_v53 = vrot.slane %v2229_v20, 4  ;;  %v2195_v4 = vadd.f32 %v2194_v49, %v2193_v51 }
 0x32e   :  { %v2145_v52 = vpop.f32.mrf.mxu1  ;;  %v4466_v54 = vadd.f32 %v2181_v47, %v2163_v28  ;;  %v2231_v62 = vadd.f32 %v2230_v53, %v2229_v20  ;;  %v2196_v36 = vrot.slane %v2195_v4, 2  ;;  %v3647_v28 = vld [vmem:[%s4535_s3 + $0x3] ss:$0 sm:$0xff] }
 0x32f   :  { %v2126_v55 = vpop.f32.mrf.mxu0 }
 0x330   :  { %v2127_v57 = vadd.f32 %v2126_v55, %v2108_v44  ;;  %v2219_v58 = vmul.f32 %v4466_v54, %v4466_v54  ;;  %v2232_v8 = vrot.slane %v2231_v62, 2  ;;  %v2197_v46 = vadd.f32 %v2196_v36, %v2195_v4  ;;  %v3646_v44 = vld [vmem:[%s4535_s3 + $0x2] ss:$0 sm:$0xff] }
 0x332   :  { %v2146_v27 = vadd.f32 %v2145_v52, %v2127_v57  ;;  %v2164_v1 = vpop.f32.mrf.mxu2  ;;  %v2183_v38 = vpop.f32.mrf.mxu3  ;;  %v2233_v23 = vadd.f32 %v2232_v8, %v2231_v62  ;;  %v2198_v11 = vrot.slane %v2197_v46, 1 }
 0x334   :  { %v2165_v60 = vadd.f32 %v2164_v1, %v2146_v27  ;;  %v2234_v41 = vrot.slane %v2233_v23, 1  ;;  %v2199_v0 = vadd.f32 %v2198_v11, %v2197_v46 }
 0x336   :  { %v4468_v2 = vadd.f32 %v2183_v38, %v2165_v60  ;;  %v2235_v24 = vadd.f32 %v2234_v41, %v2233_v23 }
 0x338   :  { %v2207_v43 = vadd.f32 %v4468_v2, %v4466_v54  ;;  %v2221_v39 = vmul.f32 %v4468_v2, %v4468_v2 }
 0x33a   :  { %v2208_v59 = vrot.slane %v2207_v43, 4  ;;  %v2243_v19 = vadd.f32 %v2221_v39, %v2219_v58 }
 0x33c   :  { %v2209_v13 = vadd.f32 %v2208_v59, %v2207_v43  ;;  %v2244_v3 = vrot.slane %v2243_v19, 4 }
 0x33e   :  { %v2210_v22 = vrot.slane %v2209_v13, 2  ;;  %v2245_v9 = vadd.f32 %v2244_v3, %v2243_v19 }
 0x340   :  { %v2211_v12 = vadd.f32 %v2210_v22, %v2209_v13  ;;  %v2246_v15 = vrot.slane %v2245_v9, 2 }
 0x342   :  { %v2212_v25 = vrot.slane %v2211_v12, 1  ;;  %v2247_v26 = vadd.f32 %v2246_v15, %v2245_v9 }
 0x344   :  { %v2213_v61 = vadd.f32 %v2212_v25, %v2211_v12  ;;  %v2248_v50 = vrot.slane %v2247_v26, 1 }
 0x346   :  { %v2255_v18 = vsel %vm1042_vm6, %v2213_v61, %v2199_v0  ;;  %v2249_v29 = vadd.f32 %v2248_v50, %v2247_v26 }
 0x347   :  { %2294 = vmatmul.f32.vlgmr.msra.gmra.mxu1 %v2255_v18 }
 0x348   :  { %v2304_v56 = vsel %vm1042_vm6, %v2249_v29, %v2235_v24 }
 0x349   :  { %2343 = vmatmul.f32.vlgmr.msra.gmra.mxu3 %v2304_v56 }
 0x3a0   :  { %v2275_v42 = vpop.f32.mrf.mxu0 }
 0x3a8   :  { %v2324_v34 = vpop.f32.mrf.mxu2 }
 0x3c4   :  { %v2295_v31 = vpop.f32.mrf.mxu1 }
 0x3c5   :  { %v2296_v7 = vadd.f32 %v2295_v31, %v2275_v42 }
 0x3c7   :  { %v2298_v35 = vmul.f32 0.00390625, %v2296_v7 }
 0x3c9   :  { %v2348_v63 = vmul.f32 %v2298_v35, %v2298_v35 }
 0x3cc   :  { %v2344_v33 = vpop.f32.mrf.mxu3 }
 0x3cd   :  { %v2345_v37 = vadd.f32 %v2344_v33, %v2324_v34 }
 0x3cf   :  { %v2347_v17 = vmul.f32 0.00390625, %v2345_v37 }
 0x3d1   :  { %v2349_v5 = vsub.f32 %v2347_v17, %v2348_v63 }
 0x3d3   :  { %v2350_v6 = vadd.f32 1e-05, %v2349_v5  ;;  %v3688_v5 = vld [vmem:[%s4532_s0] sm:$0xff] }
 0x3d5   :  { %3650 = vrsqrt.f32 %v2350_v6  ;;  %vm2357_vm4 = vweird.f32 %v2350_v6 }
 0x3db   :  { %v3651_v45 = vpop.eup %3650 }
 0x3dc   :  { %v2352_v47 = vmul.f32 %v3651_v45, %v2350_v6  ;;  %vm2358_vm3 = vweird.f32 %v3651_v45 }
 0x3dd   :  { %vm2359_vm5 = vmor %vm2357_vm4, %vm2358_vm3 }
 0x3de   :  { %v2353_v48 = vmul.f32 %v3651_v45, %v2352_v47 }
 0x3e0   :  { %v2354_v51 = vmul.f32 0.5, %v2353_v48 }
 0x3e2   :  { %v2355_v21 = vsub.f32 1.5, %v2354_v51  ;;  %v3690_v51 = vld [vmem:[%s4532_s0 + $0x10] sm:$0xff] }
 0x3e4   :  { %v2356_v20 = vmul.f32 %v3651_v45, %v2355_v21 }
 0x3e6   :  { %v2360_v55 = vsel %vm2359_vm5, %v3651_v45, %v2356_v20  ;;  %v3689_v45 = vld [vmem:[%s4532_s0 + $0x8] sm:$0xff] }
 0x3e7   :  { %v2362_v49 = vmul.f32 %v3646_v44, %v2360_v55  ;;  %v3691_v44 = vld [vmem:[%s4532_s0 + $0x18] sm:$0xff] }
 0x3e9   :  { %v2363_v57 = vmul.f32 %v2362_v49, %v2298_v35  ;;  %3440 = vmatmul.msk.f32.vlgmr.msrb.gmra.mxu0 %vm1159_vm10, %v2362_v49  ;;  %3441 = vmatmul.msk.f32.vlgmr.msrb.gmra.mxu1 %vm1159_vm10, %v2362_v49  ;;  %v3692_v49 = vld [vmem:[%s4532_s0 + $0x20] sm:$0xff] }
 0x3eb   :  { %v2365_v52 = vsub.f32 %v3647_v28, %v2363_v57  ;;  %v3693_v57 = vld [vmem:[%s4532_s0 + $0x28] sm:$0xff] }
 0x3ed   :  { %3442 = vmatmul.msk.f32.vlgmr.msrb.gmra.mxu2 %vm1159_vm10, %v2365_v52  ;;  %3443 = vmatmul.msk.f32.vlgmr.msrb.gmra.mxu3 %vm1159_vm10, %v2365_v52 }
 0x466   :  { %v2406_v53 = vpop.f32.mrf.mxu1  ;;  %v2386_v1 = vpop.f32.mrf.mxu0 }
 0x467   :  { %v2454_v27 = vrot.slane %v2406_v53, 7  ;;  %v3694_v53 = vld [vmem:[%s4532_s0 + $0x30] sm:$0xff] }
 0x469   :  { %v2456_v4 = vsel %vm1042_vm6, %v2386_v1, %v2454_v27  ;;  %v2455_v60 = vsel %vm76_vm0, %v2386_v1, %v2454_v27  ;;  %v3695_v1 = vld [vmem:[%s4532_s0 + $0x38] sm:$0xff] }
 0x46a   :  { %v2457_v38 = vrot.slane %v2456_v4, 1  ;;  %v2458_v62 = vperm.slane %v2455_v60, 0  ;;  %v2459_v36 = vperm.slane %v2455_v60, 1 }
 0x46c   :  { %v2460_v43 = vperm.slane %v2457_v38, 0  ;;  %v2461_v39 = vperm.slane %v2457_v38, 1  ;;  %v2466_v19 = vmul.f32 %v2458_v62, %v4436_v32  ;;  %v2467_v46 = vmul.f32 %v2459_v36, %v4458_v16 }
 0x46d   :  { %v2468_v23 = vmul.f32 %v2458_v62, %v4434_v30  ;;  %v2469_v12 = vmul.f32 %v2459_v36, %v4456_v40 }
 0x46e   :  { %v2470_v15 = vmul.f32 %v2460_v43, %v4444_v10  ;;  %v2471_v25 = vmul.f32 %v2461_v39, %v4466_v54  ;;  %v2472_v26 = vmul.f32 %v2460_v43, %v4446_v14  ;;  %v2473_v61 = vmul.f32 %v2461_v39, %v4468_v2 }
 0x470   :  { %v2449_v58 = vpop.f32.mrf.mxu3  ;;  %v2429_v59 = vpop.f32.mrf.mxu2 }
 0x471   :  { %v2476_v8 = vrot.slane %v2449_v58, 7 }
 0x473   :  { %v2477_v13 = vsel %vm76_vm0, %v2429_v59, %v2476_v8  ;;  %v2478_v3 = vsel %vm1042_vm6, %v2429_v59, %v2476_v8 }
 0x474   :  { %v2479_v22 = vrot.slane %v2478_v3, 1  ;;  %v2480_v9 = vperm.slane %v2477_v13, 0  ;;  %v2481_v11 = vperm.slane %v2477_v13, 1 }
 0x476   :  { %v2482_v32 = vperm.slane %v2479_v22, 0  ;;  %v2483_v41 = vperm.slane %v2479_v22, 1  ;;  %v2488_v16 = vadd.f32 %v2480_v9, %v2466_v19  ;;  %v2489_v0 = vadd.f32 %v2481_v11, %v2467_v46 }
 0x477   :  { %v2490_v50 = vadd.f32 %v2480_v9, %v2468_v23  ;;  %v2491_v18 = vadd.f32 %v2481_v11, %v2469_v12 }
 0x478   :  { %v2492_v30 = vadd.f32 %v2482_v32, %v2470_v15  ;;  %v2493_v24 = vadd.f32 %v2483_v41, %v2471_v25  ;;  %v2494_v29 = vadd.f32 %v2482_v32, %v2472_v26  ;;  %v2495_v56 = vadd.f32 %v2483_v41, %v2473_v61 }
 0x479   :  { %vm2496_vm0 = vcmp.gt.f32.partialorder %v2488_v16, 0.0  ;;  %vm2497_vm6 = vcmp.gt.f32.partialorder %v2489_v0, 0.0  ;;  %vm2498_vm8 = vcmp.gt.f32.partialorder %v2490_v50, 0.0  ;;  %vm2499_vm9 = vcmp.gt.f32.partialorder %v2491_v18, 0.0 }
 0x47a   :  { %vm2500_vm10 = vcmp.gt.f32.partialorder %v2492_v30, 0.0  ;;  %vm2501_vm11 = vcmp.gt.f32.partialorder %v2493_v24, 0.0  ;;  %vm2502_vm12 = vcmp.gt.f32.partialorder %v2494_v29, 0.0  ;;  %v2504_v10 = vmul.f32 0.01, %v2488_v16 }
 0x47b   :  { %v2505_v14 = vmul.f32 0.01, %v2489_v0  ;;  %v2506_v40 = vmul.f32 0.01, %v2490_v50  ;;  %v2507_v54 = vmul.f32 0.01, %v2491_v18 }
 0x47c   :  { %v2508_v31 = vmul.f32 0.01, %v2492_v30  ;;  %v2509_v42 = vmul.f32 0.01, %v2493_v24  ;;  %v2510_v2 = vmul.f32 0.01, %v2494_v29  ;;  %v2512_v35 = vsel %vm2496_vm0, %v2488_v16, %v2504_v10 }
 0x47d   :  { %v2511_v7 = vmul.f32 0.01, %v2495_v56  ;;  %v2513_v34 = vsel %vm2497_vm6, %v2489_v0, %v2505_v14  ;;  %vm2503_vm13 = vcmp.gt.f32.partialorder %v2495_v56, 0.0  ;;  %v2514_v33 = vsel %vm2498_vm8, %v2490_v50, %v2506_v40 }
 0x47e   :  { %v2515_v37 = vsel %vm2499_vm9, %v2491_v18, %v2507_v54  ;;  %v2516_v63 = vsel %vm2500_vm10, %v2492_v30, %v2508_v31  ;;  %v2517_v17 = vsel %vm2501_vm11, %v2493_v24, %v2509_v42  ;;  %v2520_v6 = vadd.f32 %v3688_v5, %v2512_v35 }
 0x47f   :  { %v2521_v47 = vadd.f32 %v3689_v45, %v2513_v34  ;;  %v2518_v48 = vsel %vm2502_vm12, %v2494_v29, %v2510_v2  ;;  %v2522_v21 = vadd.f32 %v3690_v51, %v2514_v33  ;;  %v2523_v20 = vadd.f32 %v3691_v44, %v2515_v37 }
 0x480   :  { %v2519_v55 = vsel %vm2503_vm13, %v2495_v56, %v2511_v7  ;;  %v2524_v28 = vadd.f32 %v3692_v49, %v2516_v63  ;;  %2528 = vst [vmem:[#allocation7] sm:$0xff] %v2520_v6  ;;  %v2525_v52 = vadd.f32 %v3693_v57, %v2517_v17  ;;  %v2526_v27 = vadd.f32 %v3694_v53, %v2518_v48 }
 0x481   :  { %2529 = vst [vmem:[#allocation7 + $0x8] sm:$0xff] %v2521_v47  ;;  %v2527_v4 = vadd.f32 %v3695_v1, %v2519_v55 }
 0x482   :  { %2530 = vst [vmem:[#allocation7 + $0x10] sm:$0xff] %v2522_v21 }
 0x483   :  { %2531 = vst [vmem:[#allocation7 + $0x18] sm:$0xff] %v2523_v20 }
 0x484   :  { %2532 = vst [vmem:[#allocation7 + $0x20] sm:$0xff] %v2524_v28 }
 0x485   :  { %2533 = vst [vmem:[#allocation7 + $0x28] sm:$0xff] %v2525_v52 }
 0x486   :  { %2534 = vst [vmem:[#allocation7 + $0x30] sm:$0xff] %v2526_v27 }
 0x487   :  { %2535 = vst [vmem:[#allocation7 + $0x38] sm:$0xff] %v2527_v4 }
 0x488   :  { %2548 = dma.vmem_to_hbm [thread:$0]  %s2541_s29, 1024, %s2543_s8, [#allocation4], %s3780_s11, %s3780_s11, %s3781_s6  }
 0x489   :  { %3772 = dma.done.wait [#allocation4], 1024  }
 0x48a   :  { %3773 = vsyncadd [#allocation4], 4294966272 }
 0x48b   :  { %2553 = vsyncpa [#allocation3], 1 }
 0x48c   :  { %2554 = vsyncpa [#allocation6], 1 }
 0x48d   :  { %2555 = vsyncpa [#allocation4], 1 }

</bundles_post_ra>
